<compile_context>
chip_gen: v7x
topology: tpu7x:2x2x1
jax: 0.10.0
libtpu: 0.0.40
codegen_flags: <defaults>
</compile_context>

<pallas_src>
import functools

import jax
import jax.numpy as jnp
from jax import lax
from jax.experimental import pallas as pl
from jax.experimental.pallas import tpu as pltpu


def _round_up(x, m):
    return ((x + m - 1) // m) * m


def _dwsep_kernel(x_ref, w1_ref, b1_ref, w2_ref, b2_ref, o_ref,
                  *, h_out, w_out, stride):
    """One image: depthwise 3x3 (VPU stencil) + BN1 + ReLU6 -> pointwise 1x1 (MXU) + BN2 + ReLU6.

    x_ref:  (H+2, W+2, CI_PAD)    bf16  spatially+channel padded activation
    w1_ref: (9, CI_PAD)           f32   depthwise taps * BN1 scale
    b1_ref: (1, CI_PAD)           f32   BN1 shift
    w2_ref: (CI_PAD, CO_PAD)      bf16  pointwise weight * BN2 scale
    b2_ref: (1, CO_PAD)           f32   BN2 shift
    o_ref:  (h_out*w_out, CO_PAD) bf16
    """
    hp, wp, ci = x_ref.shape
    h_full, w_full = hp - 2, wp - 2            # stride-1 output extent

    # ---- depthwise 3x3 as a VPU stencil: channels on lanes, 9 shifted ----
    # ---- multiply-adds from the VMEM-resident image (no im2col / no MXU). ----
    xf = x_ref[...].astype(jnp.float32)        # single bf16->f32 pass; f32 VPU math (v5e-safe)
    w1 = w1_ref[...]                           # (9, CI_PAD) f32
    acc = jnp.zeros((h_full, w_full, ci), jnp.float32)
    for kh in range(3):
        for kw in range(3):
            tap = xf[kh:kh + h_full, kw:kw + w_full, :]
            acc = acc + tap * w1[3 * kh + kw][None, :]
    h = jnp.minimum(jnp.maximum(acc + b1_ref[...], 0.0), 6.0)

    if stride != 1:
        # TODO(synk): stride>1 computes the stride-1 stencil and subsamples;
        # strided tap slices would avoid the stride^2 compute waste.
        h = h[::stride, ::stride, :][:h_out, :w_out, :]

    # ---- pointwise 1x1 on the MXU: bf16 operands, f32 accumulation. ----
    h2 = h.reshape(h_out * w_out, ci).astype(jnp.bfloat16)
    y = jnp.dot(h2, w2_ref[...], preferred_element_type=jnp.float32)
    y = jnp.minimum(jnp.maximum(y + b2_ref[...], 0.0), 6.0)
    o_ref[...] = y.astype(o_ref.dtype)         # bf16 store: halves the HBM write


@functools.partial(jax.jit, static_argnames=("stride", "eps"))
def depthwise_block(x_nhwc, w_dw_hwc, w_pw_io, bn1, bn2, *, stride=1, eps=1e-5):
    """Depthwise(3x3, pad=1, groups=C_in) -> BN -> ReLU6 -> 1x1 conv -> BN -> ReLU6.

    x_nhwc:   (N, H, W, C_in)
    w_dw_hwc: (3, 3, C_in)        depthwise kernel per channel
    w_pw_io:  (C_in, C_out)       pointwise kernel
    bn1, bn2: (gamma, beta, running_mean, running_var)   (eval-mode BN)
    Returns bf16 (N, H_out, W_out, C_out).
    """
    N, H, W, C_in = x_nhwc.shape
    KH, KW, _ = w_dw_hwc.shape
    C_out = w_pw_io.shape[1]
    pad = 1
    H_out = (H + 2 * pad - KH) // stride + 1
    W_out = (W + 2 * pad - KW) // stride + 1

    CI_PAD = _round_up(max(C_in, 128), 128)
    CO_PAD = _round_up(max(C_out, 128), 128)

    # ---- fold eval-mode BN into the conv weights (convs have no bias). ----
    g1, be1, m1, v1 = bn1
    g2, be2, m2, v2 = bn2
    s1 = g1 / jnp.sqrt(v1 + eps)
    s2 = g2 / jnp.sqrt(v2 + eps)
    w1 = (w_dw_hwc * s1[None, None, :]).reshape(KH * KW, C_in)     # (9, C_in) f32
    b1 = be1 - s1 * m1
    w2 = w_pw_io * s2[None, :]
    b2 = be2 - s2 * m2

    # ---- bf16-first padding: one padded bf16 activation copy, nothing else. ----
    x_p = jnp.pad(x_nhwc.astype(jnp.bfloat16),
                  ((0, 0), (pad, pad), (pad, pad), (0, CI_PAD - C_in)))
    w1_p = jnp.pad(w1, ((0, 0), (0, CI_PAD - C_in)))                         # f32
    b1_p = jnp.pad(b1, (0, CI_PAD - C_in)).reshape(1, CI_PAD)                # f32
    w2_p = jnp.pad(w2, ((0, CI_PAD - C_in), (0, CO_PAD - C_out))).astype(jnp.bfloat16)
    b2_p = jnp.pad(b2, (0, CO_PAD - C_out)).reshape(1, CO_PAD)               # f32

    kern = functools.partial(_dwsep_kernel, h_out=H_out, w_out=W_out, stride=stride)

    out = pl.pallas_call(
        kern,
        out_shape=jax.ShapeDtypeStruct((N, H_out * W_out, CO_PAD), jnp.bfloat16),
        grid=(N,),
        in_specs=[
            # one padded image per grid step; block == full array in the last 3 dims
            pl.BlockSpec((None, H + 2 * pad, W + 2 * pad, CI_PAD),
                         lambda n: (n, 0, 0, 0)),
            pl.BlockSpec((KH * KW, CI_PAD), lambda n: (0, 0)),
            pl.BlockSpec((1, CI_PAD), lambda n: (0, 0)),
            pl.BlockSpec((CI_PAD, CO_PAD), lambda n: (0, 0)),
            pl.BlockSpec((1, CO_PAD), lambda n: (0, 0)),
        ],
        out_specs=pl.BlockSpec((None, H_out * W_out, CO_PAD), lambda n: (n, 0, 0)),
        compiler_params=pltpu.CompilerParams(
            dimension_semantics=("parallel",),
            vmem_limit_bytes=32 * 1024 * 1024),
    )(x_p, w1_p, b1_p, w2_p, b2_p)

    out = out[:, :, :C_out].reshape(N, H_out, W_out, C_out)
    return out


def _reference(x_nhwc, w_dw_hwc, w_pw_io, bn1, bn2, stride=1, eps=1e-5):
    """Pure-JAX f32 reference with the same (eval-mode BN) semantics."""
    C_in = x_nhwc.shape[-1]
    g1, be1, m1, v1 = bn1
    g2, be2, m2, v2 = bn2
    y = lax.conv_general_dilated(
        x_nhwc, w_dw_hwc[:, :, None, :], window_strides=(stride, stride),
        padding=((1, 1), (1, 1)),
        dimension_numbers=("NHWC", "HWIO", "NHWC"),
        feature_group_count=C_in)
    y = (y - m1) * (g1 / jnp.sqrt(v1 + eps)) + be1
    y = jnp.clip(y, 0.0, 6.0)
    y = lax.conv_general_dilated(
        y, w_pw_io[None, None, :, :], window_strides=(1, 1), padding="VALID",
        dimension_numbers=("NHWC", "HWIO", "NHWC"))
    y = (y - m2) * (g2 / jnp.sqrt(v2 + eps)) + be2
    return jnp.clip(y, 0.0, 6.0)


if __name__ == "__main__":
    key = jax.random.PRNGKey(0)
    keys = jax.random.split(key, 11)

    # Depthwise(in_channels=4, out_channels=8, stride=1), input (N=2, C=4, 16, 16).
    N, C_in, H, W = 2, 4, 16, 16
    C_out = 8
    stride = 1

    # PyTorch-convention input (NCHW), converted to NHWC for the kernel.
    x_nchw = jax.random.normal(keys[0], (N, C_in, H, W), dtype=jnp.float32)
    x_nhwc = jnp.transpose(x_nchw, (0, 2, 3, 1))

    # Depthwise conv weight, PyTorch layout (C_in, 1, 3, 3), bias=False.
    w_dw = 0.1 * jax.random.normal(keys[1], (C_in, 1, 3, 3), dtype=jnp.float32)
    w_dw_hwc = jnp.transpose(w_dw[:, 0], (1, 2, 0))          # (3, 3, C_in)

    # Pointwise conv weight, PyTorch layout (C_out, C_in, 1, 1), bias=False.
    w_pw = 0.1 * jax.random.normal(keys[2], (C_out, C_in, 1, 1), dtype=jnp.float32)
    w_pw_io = jnp.transpose(w_pw[:, :, 0, 0], (1, 0))        # (C_in, C_out)

    # BatchNorm parameters / running stats (eval mode).
    bn1 = (1.0 + 0.1 * jax.random.normal(keys[3], (C_in,), dtype=jnp.float32),
           0.1 * jax.random.normal(keys[4], (C_in,), dtype=jnp.float32),
           0.1 * jax.random.normal(keys[5], (C_in,), dtype=jnp.float32),
           jnp.abs(1.0 + 0.1 * jax.random.normal(keys[6], (C_in,), dtype=jnp.float32)))
    bn2 = (1.0 + 0.1 * jax.random.normal(keys[7], (C_out,), dtype=jnp.float32),
           0.1 * jax.random.normal(keys[8], (C_out,), dtype=jnp.float32),
           0.1 * jax.random.normal(keys[9], (C_out,), dtype=jnp.float32),
           jnp.abs(1.0 + 0.1 * jax.random.normal(keys[10], (C_out,), dtype=jnp.float32)))

    out = depthwise_block(x_nhwc, w_dw_hwc, w_pw_io, bn1, bn2, stride=stride)
    out = jax.block_until_ready(out)

    ref = _reference(x_nhwc, w_dw_hwc, w_pw_io, bn1, bn2, stride=stride)
    assert out.shape == (N, H, W, C_out)
    # bf16 activations / weights / output vs. f32 reference -> relaxed tolerance.
    out_f32 = out.astype(jnp.float32)
    assert jnp.allclose(out_f32, ref, atol=3e-2, rtol=3e-2), float(
        jnp.max(jnp.abs(out_f32 - ref)))

    print("KERNEL_OK")
</pallas_src>

<mosaic_0001>
module attributes {stable_mosaic.version = 11 : i64} {
  func.func @_dwsep_kernel(%arg0: i32, %arg1: memref<1x18x18x128xbf16, #tpu.memory_space<vmem>>, %arg2: memref<9x128xf32, #tpu.memory_space<vmem>>, %arg3: memref<1x128xf32, #tpu.memory_space<vmem>>, %arg4: memref<128x128xbf16, #tpu.memory_space<vmem>>, %arg5: memref<1x128xf32, #tpu.memory_space<vmem>>, %arg6: memref<1x256x128xbf16, #tpu.memory_space<vmem>>) attributes {dimension_semantics = [#tpu.dimension_semantics<parallel>], iteration_bounds = array<i64: 2>, scalar_prefetch = 0 : i64, scratch_operands = 0 : i64, tpu.core_type = #tpu.core_type<tc>, window_params = [{transform_indices = @transform_0, window_bounds = array<i64: 1, 18, 18, 128>}, {pipeline_mode = #tpu.pipeline_mode<synchronous>, transform_indices = @transform_1, window_bounds = array<i64: 9, 128>}, {pipeline_mode = #tpu.pipeline_mode<synchronous>, transform_indices = @transform_2, window_bounds = array<i64: 1, 128>}, {pipeline_mode = #tpu.pipeline_mode<synchronous>, transform_indices = @transform_3, window_bounds = array<i64: 128, 128>}, {pipeline_mode = #tpu.pipeline_mode<synchronous>, transform_indices = @transform_4, window_bounds = array<i64: 1, 128>}, {transform_indices = @transform_5, window_bounds = array<i64: 1, 256, 128>}]} {
    %c0 = arith.constant 0 : index
    %c0_0 = arith.constant 0 : index
    %c0_1 = arith.constant 0 : index
    %c0_2 = arith.constant 0 : index
    %0 = vector.load %arg1[%c0, %c0_0, %c0_1, %c0_2] : memref<1x18x18x128xbf16, #tpu.memory_space<vmem>>, vector<1x18x18x128xbf16>
    %1 = vector.shape_cast %0 : vector<1x18x18x128xbf16> to vector<18x18x128xbf16>
    %2 = arith.extf %1 : vector<18x18x128xbf16> to vector<18x18x128xf32>
    %c0_3 = arith.constant 0 : index
    %c0_4 = arith.constant 0 : index
    %3 = vector.load %arg2[%c0_3, %c0_4] : memref<9x128xf32, #tpu.memory_space<vmem>>, vector<9x128xf32>
    %cst = arith.constant 0.000000e+00 : f32
    %4 = vector.broadcast %cst : f32 to vector<16x16x128xf32>
    %5 = vector.extract_strided_slice %2 {offsets = [0, 0, 0], sizes = [16, 16, 128], strides = [1, 1, 1]} : vector<18x18x128xf32> to vector<16x16x128xf32>
    %6 = vector.extract_strided_slice %3 {offsets = [0, 0], sizes = [1, 128], strides = [1, 1]} : vector<9x128xf32> to vector<1x128xf32>
    %7 = vector.shape_cast %6 : vector<1x128xf32> to vector<128xf32>
    %8 = vector.shape_cast %7 : vector<128xf32> to vector<1x128xf32>
    %9 = vector.shape_cast %8 : vector<1x128xf32> to vector<1x1x128xf32>
    %10 = vector.broadcast %9 : vector<1x1x128xf32> to vector<16x16x128xf32>
    %11 = arith.mulf %5, %10 : vector<16x16x128xf32>
    %12 = arith.addf %4, %11 : vector<16x16x128xf32>
    %13 = vector.extract_strided_slice %2 {offsets = [0, 1, 0], sizes = [16, 16, 128], strides = [1, 1, 1]} : vector<18x18x128xf32> to vector<16x16x128xf32>
    %14 = vector.extract_strided_slice %3 {offsets = [1, 0], sizes = [1, 128], strides = [1, 1]} : vector<9x128xf32> to vector<1x128xf32>
    %15 = vector.shape_cast %14 : vector<1x128xf32> to vector<128xf32>
    %16 = vector.shape_cast %15 : vector<128xf32> to vector<1x128xf32>
    %17 = vector.shape_cast %16 : vector<1x128xf32> to vector<1x1x128xf32>
    %18 = vector.broadcast %17 : vector<1x1x128xf32> to vector<16x16x128xf32>
    %19 = arith.mulf %13, %18 : vector<16x16x128xf32>
    %20 = arith.addf %12, %19 : vector<16x16x128xf32>
    %21 = vector.extract_strided_slice %2 {offsets = [0, 2, 0], sizes = [16, 16, 128], strides = [1, 1, 1]} : vector<18x18x128xf32> to vector<16x16x128xf32>
    %22 = vector.extract_strided_slice %3 {offsets = [2, 0], sizes = [1, 128], strides = [1, 1]} : vector<9x128xf32> to vector<1x128xf32>
    %23 = vector.shape_cast %22 : vector<1x128xf32> to vector<128xf32>
    %24 = vector.shape_cast %23 : vector<128xf32> to vector<1x128xf32>
    %25 = vector.shape_cast %24 : vector<1x128xf32> to vector<1x1x128xf32>
    %26 = vector.broadcast %25 : vector<1x1x128xf32> to vector<16x16x128xf32>
    %27 = arith.mulf %21, %26 : vector<16x16x128xf32>
    %28 = arith.addf %20, %27 : vector<16x16x128xf32>
    %29 = vector.extract_strided_slice %2 {offsets = [1, 0, 0], sizes = [16, 16, 128], strides = [1, 1, 1]} : vector<18x18x128xf32> to vector<16x16x128xf32>
    %30 = vector.extract_strided_slice %3 {offsets = [3, 0], sizes = [1, 128], strides = [1, 1]} : vector<9x128xf32> to vector<1x128xf32>
    %31 = vector.shape_cast %30 : vector<1x128xf32> to vector<128xf32>
    %32 = vector.shape_cast %31 : vector<128xf32> to vector<1x128xf32>
    %33 = vector.shape_cast %32 : vector<1x128xf32> to vector<1x1x128xf32>
    %34 = vector.broadcast %33 : vector<1x1x128xf32> to vector<16x16x128xf32>
    %35 = arith.mulf %29, %34 : vector<16x16x128xf32>
    %36 = arith.addf %28, %35 : vector<16x16x128xf32>
    %37 = vector.extract_strided_slice %2 {offsets = [1, 1, 0], sizes = [16, 16, 128], strides = [1, 1, 1]} : vector<18x18x128xf32> to vector<16x16x128xf32>
    %38 = vector.extract_strided_slice %3 {offsets = [4, 0], sizes = [1, 128], strides = [1, 1]} : vector<9x128xf32> to vector<1x128xf32>
    %39 = vector.shape_cast %38 : vector<1x128xf32> to vector<128xf32>
    %40 = vector.shape_cast %39 : vector<128xf32> to vector<1x128xf32>
    %41 = vector.shape_cast %40 : vector<1x128xf32> to vector<1x1x128xf32>
    %42 = vector.broadcast %41 : vector<1x1x128xf32> to vector<16x16x128xf32>
    %43 = arith.mulf %37, %42 : vector<16x16x128xf32>
    %44 = arith.addf %36, %43 : vector<16x16x128xf32>
    %45 = vector.extract_strided_slice %2 {offsets = [1, 2, 0], sizes = [16, 16, 128], strides = [1, 1, 1]} : vector<18x18x128xf32> to vector<16x16x128xf32>
    %46 = vector.extract_strided_slice %3 {offsets = [5, 0], sizes = [1, 128], strides = [1, 1]} : vector<9x128xf32> to vector<1x128xf32>
    %47 = vector.shape_cast %46 : vector<1x128xf32> to vector<128xf32>
    %48 = vector.shape_cast %47 : vector<128xf32> to vector<1x128xf32>
    %49 = vector.shape_cast %48 : vector<1x128xf32> to vector<1x1x128xf32>
    %50 = vector.broadcast %49 : vector<1x1x128xf32> to vector<16x16x128xf32>
    %51 = arith.mulf %45, %50 : vector<16x16x128xf32>
    %52 = arith.addf %44, %51 : vector<16x16x128xf32>
    %53 = vector.extract_strided_slice %2 {offsets = [2, 0, 0], sizes = [16, 16, 128], strides = [1, 1, 1]} : vector<18x18x128xf32> to vector<16x16x128xf32>
    %54 = vector.extract_strided_slice %3 {offsets = [6, 0], sizes = [1, 128], strides = [1, 1]} : vector<9x128xf32> to vector<1x128xf32>
    %55 = vector.shape_cast %54 : vector<1x128xf32> to vector<128xf32>
    %56 = vector.shape_cast %55 : vector<128xf32> to vector<1x128xf32>
    %57 = vector.shape_cast %56 : vector<1x128xf32> to vector<1x1x128xf32>
    %58 = vector.broadcast %57 : vector<1x1x128xf32> to vector<16x16x128xf32>
    %59 = arith.mulf %53, %58 : vector<16x16x128xf32>
    %60 = arith.addf %52, %59 : vector<16x16x128xf32>
    %61 = vector.extract_strided_slice %2 {offsets = [2, 1, 0], sizes = [16, 16, 128], strides = [1, 1, 1]} : vector<18x18x128xf32> to vector<16x16x128xf32>
    %62 = vector.extract_strided_slice %3 {offsets = [7, 0], sizes = [1, 128], strides = [1, 1]} : vector<9x128xf32> to vector<1x128xf32>
    %63 = vector.shape_cast %62 : vector<1x128xf32> to vector<128xf32>
    %64 = vector.shape_cast %63 : vector<128xf32> to vector<1x128xf32>
    %65 = vector.shape_cast %64 : vector<1x128xf32> to vector<1x1x128xf32>
    %66 = vector.broadcast %65 : vector<1x1x128xf32> to vector<16x16x128xf32>
    %67 = arith.mulf %61, %66 : vector<16x16x128xf32>
    %68 = arith.addf %60, %67 : vector<16x16x128xf32>
    %69 = vector.extract_strided_slice %2 {offsets = [2, 2, 0], sizes = [16, 16, 128], strides = [1, 1, 1]} : vector<18x18x128xf32> to vector<16x16x128xf32>
    %70 = vector.extract_strided_slice %3 {offsets = [8, 0], sizes = [1, 128], strides = [1, 1]} : vector<9x128xf32> to vector<1x128xf32>
    %71 = vector.shape_cast %70 : vector<1x128xf32> to vector<128xf32>
    %72 = vector.shape_cast %71 : vector<128xf32> to vector<1x128xf32>
    %73 = vector.shape_cast %72 : vector<1x128xf32> to vector<1x1x128xf32>
    %74 = vector.broadcast %73 : vector<1x1x128xf32> to vector<16x16x128xf32>
    %75 = arith.mulf %69, %74 : vector<16x16x128xf32>
    %76 = arith.addf %68, %75 : vector<16x16x128xf32>
    %c0_5 = arith.constant 0 : index
    %c0_6 = arith.constant 0 : index
    %77 = vector.load %arg3[%c0_5, %c0_6] : memref<1x128xf32, #tpu.memory_space<vmem>>, vector<1x128xf32>
    %78 = vector.shape_cast %77 : vector<1x128xf32> to vector<1x1x128xf32>
    %79 = vector.broadcast %78 : vector<1x1x128xf32> to vector<16x16x128xf32>
    %80 = arith.addf %76, %79 : vector<16x16x128xf32>
    %cst_7 = arith.constant 0.000000e+00 : f32
    %81 = vector.broadcast %cst_7 : f32 to vector<16x16x128xf32>
    %82 = arith.maximumf %80, %81 : vector<16x16x128xf32>
    %cst_8 = arith.constant 6.000000e+00 : f32
    %83 = vector.broadcast %cst_8 : f32 to vector<16x16x128xf32>
    %84 = arith.minimumf %82, %83 : vector<16x16x128xf32>
    %85 = vector.shape_cast %84 : vector<16x16x128xf32> to vector<256x128xf32>
    %86 = arith.truncf %85 : vector<256x128xf32> to vector<256x128xbf16>
    %c0_9 = arith.constant 0 : index
    %c0_10 = arith.constant 0 : index
    %87 = vector.load %arg4[%c0_9, %c0_10] : memref<128x128xbf16, #tpu.memory_space<vmem>>, vector<128x128xbf16>
    %cst_11 = arith.constant dense<0.000000e+00> : vector<256x128xf32>
    %88 = tpu.matmul %86, %87, %cst_11 {dimension_numbers = #tpu.dot_dimension_numbers<[1], [0], [0], [1], [0, 0, 1, 1], [], []>} : vector<256x128xbf16>, vector<128x128xbf16>, vector<256x128xf32> -> vector<256x128xf32>
    %c0_12 = arith.constant 0 : index
    %c0_13 = arith.constant 0 : index
    %89 = vector.load %arg5[%c0_12, %c0_13] : memref<1x128xf32, #tpu.memory_space<vmem>>, vector<1x128xf32>
    %90 = vector.broadcast %89 : vector<1x128xf32> to vector<256x128xf32>
    %91 = arith.addf %88, %90 : vector<256x128xf32>
    %cst_14 = arith.constant 0.000000e+00 : f32
    %92 = vector.broadcast %cst_14 : f32 to vector<256x128xf32>
    %93 = arith.maximumf %91, %92 : vector<256x128xf32>
    %cst_15 = arith.constant 6.000000e+00 : f32
    %94 = vector.broadcast %cst_15 : f32 to vector<256x128xf32>
    %95 = arith.minimumf %93, %94 : vector<256x128xf32>
    %96 = arith.truncf %95 : vector<256x128xf32> to vector<256x128xbf16>
    %c0_16 = arith.constant 0 : index
    %c0_17 = arith.constant 0 : index
    %c0_18 = arith.constant 0 : index
    %97 = vector.load %arg6[%c0_16, %c0_17, %c0_18] : memref<1x256x128xbf16, #tpu.memory_space<vmem>>, vector<1x256x128xbf16>
    %98 = vector.shape_cast %97 : vector<1x256x128xbf16> to vector<256x128xbf16>
    %99 = vector.shape_cast %96 : vector<256x128xbf16> to vector<1x256x128xbf16>
    tpu.vector_store %arg6[%c0_16, %c0_17, %c0_18], %99 {strides = array<i32>} : memref<1x256x128xbf16, #tpu.memory_space<vmem>>, vector<1x256x128xbf16>,
    return
  }
  func.func @transform_0(%arg0: i32) -> (i32, i32, i32, i32) {
    %c0_i32 = arith.constant 0 : i32
    %c0_i32_0 = arith.constant 0 : i32
    %c0_i32_1 = arith.constant 0 : i32
    %c0_i32_2 = arith.constant 0 : i32
    return %arg0, %c0_i32, %c0_i32_0, %c0_i32_1 : i32, i32, i32, i32
  }
  func.func @transform_1(%arg0: i32) -> (i32, i32) {
    %c0_i32 = arith.constant 0 : i32
    %c0_i32_0 = arith.constant 0 : i32
    %c0_i32_1 = arith.constant 0 : i32
    return %c0_i32, %c0_i32_0 : i32, i32
  }
  func.func @transform_2(%arg0: i32) -> (i32, i32) {
    %c0_i32 = arith.constant 0 : i32
    %c0_i32_0 = arith.constant 0 : i32
    %c0_i32_1 = arith.constant 0 : i32
    return %c0_i32, %c0_i32_0 : i32, i32
  }
  func.func @transform_3(%arg0: i32) -> (i32, i32) {
    %c0_i32 = arith.constant 0 : i32
    %c0_i32_0 = arith.constant 0 : i32
    %c0_i32_1 = arith.constant 0 : i32
    return %c0_i32, %c0_i32_0 : i32, i32
  }
  func.func @transform_4(%arg0: i32) -> (i32, i32) {
    %c0_i32 = arith.constant 0 : i32
    %c0_i32_0 = arith.constant 0 : i32
    %c0_i32_1 = arith.constant 0 : i32
    return %c0_i32, %c0_i32_0 : i32, i32
  }
  func.func @transform_5(%arg0: i32) -> (i32, i32, i32) {
    %c0_i32 = arith.constant 0 : i32
    %c0_i32_0 = arith.constant 0 : i32
    %c0_i32_1 = arith.constant 0 : i32
    return %arg0, %c0_i32, %c0_i32_0 : i32, i32, i32
  }
}

</mosaic_0001>

<bundles_post_ra>
// kernel: depthwise_block.1
= control target key start
LH: loop header
LB: loop body
LE: loop exit
PB: predicated region body
PF: predicated region fallthrough
CT: control target
= control target key end

     0   :  { %s3008_s18 = smov 0   ;;  %s4326_s0 = inlined_call_operand.vmem [shape: bf16[2,18,18,128], index: 0, kind: input, shape index: {}]   ;;  %s4327_s1 = inlined_call_operand.vmem [shape: f32[9,128], index: 1, kind: input, shape index: {}]   ;;  %s4328_s2 = inlined_call_operand.vmem [shape: f32[1,128], index: 2, kind: input, shape index: {}]   ;;  %s4329_s3 = inlined_call_operand.vmem [shape: bf16[128,128], index: 3, kind: input, shape index: {}]   ;;  %s4330_s4 = inlined_call_operand.vmem [shape: f32[1,128], index: 4, kind: input, shape index: {}]   ;;  %s4331_s5 = inlined_call_operand.vmem [shape: bf16[2,256,128], index: 5, kind: output, shape index: {}]  }
   0x1 LB: > { %s2636_s19 = sadd.s32 4294967295, %s2976_s18   ;;  %p2640_p0 = scmp.ge.s32.totalorder %s2976_s18, 1  ;;  %s2976_s18 = sphi %s3008_s18, %s15_s18  }
   0x2   : > { %p187_p1 = scmp.lt.s32.totalorder %s2976_s18, 3 }
   0x4   : > { %p188_p2 = pnand %p2640_p0, %p187_p1 }
   0x5   : > { %v2958_v0 = vld [vmem:[%s4329_s3] sm:$0xff] (!%p188_p2)   ;;  %p215_p3 = scmp.lt.s32.totalorder (!%p188_p2), %s2636_s19, 1  ;;  %v336_v1 = vlaneseq (!%p188_p2)  ;;  %v2959_v2 = vld [vmem:[%s4329_s3 + $0x8] sm:$0xff] (!%p188_p2)   ;;  %v2960_v4 = vld [vmem:[%s4329_s3 + $0x10] sm:$0xff] (!%p188_p2)   ;;  %vm504_vm0 = vcmask (!%p188_p2), 1046528   ;;  %vm749_vm1 = vcmask (!%p188_p2), 1045504  }
   0x6   : > { %191 = sbr.rel (%p188_p2) target bundleno = 574 (0x23e), region = 40  ;;  %2885 = vmatprep.subr.bf16.mxu0 (!%p188_p2), %v2958_v0  ;;  %2933 = vmatprep.subr.bf16.mxu1 (!%p188_p2), %v2958_v0  ;;  %v2961_v5 = vld [vmem:[%s4329_s3 + $0x18] sm:$0xff] (!%p188_p2)   ;;  %v3061_v24 = vld [vmem:[%s4327_s1] sm:$0xff] (!%p188_p2)  ;;  %v2963_v46 = vld [vmem:[%s4329_s3 + $0x28] sm:$0xff] (!%p188_p2)  }
   0x7   : > { %2886 = vmatpush3.bf16.msra.mxu0 (!%p188_p2), %v2958_v0  ;;  %2941 = vmatpush3.bf16.msra.mxu1 (!%p188_p2), %v2958_v0  ;;  %v3024_v3 = vshrl.u32 (!%p188_p2), %v336_v1, 7  ;;  %v2962_v29 = vld [vmem:[%s4329_s3 + $0x20] sm:$0xff] (!%p188_p2)   ;;  %v2964_v0 = vld [vmem:[%s4329_s3 + $0x30] sm:$0xff] (!%p188_p2)  }
   0x8   : > { %2887 = vmatprep.subr.bf16.mxu0 (!%p188_p2), %v2959_v2  ;;  %2934 = vmatprep.subr.bf16.mxu1 (!%p188_p2), %v2959_v2 }
   0x9   : > { %v338_v6 = vsub.s32 (!%p188_p2), 0, %v3024_v3  ;;  %v406_v7 = vsub.s32 (!%p188_p2), 1, %v3024_v3  ;;  %v651_v8 = vsub.s32 (!%p188_p2), 2, %v3024_v3  ;;  %v896_v12 = vsub.s32 (!%p188_p2), 3, %v3024_v3 }
   0xa   : > { %v964_v31 = vsub.s32 (!%p188_p2), 4, %v3024_v3  ;;  %v1208_v32 = vsub.s32 (!%p188_p2), 5, %v3024_v3  ;;  %v1452_v33 = vsub.s32 (!%p188_p2), 6, %v3024_v3  ;;  %v1520_v63 = vsub.s32 (!%p188_p2), 7, %v3024_v3 }
   0xb   : > { %2888 = vmatpush3.bf16.msra.mxu0 (!%p188_p2), %v2959_v2  ;;  %2942 = vmatpush3.bf16.msra.mxu1 (!%p188_p2), %v2959_v2  ;;  %v3066_v26 = vrot.slane (!%p188_p2), %v3061_v24, %v338_v6  ;;  %v3069_v27 = vrot.slane (!%p188_p2), %v3061_v24, %v406_v7  ;;  %v3072_v28 = vrot.slane (!%p188_p2), %v3061_v24, %v651_v8 }
   0xc   : > { %2889 = vmatprep.subr.bf16.mxu0 (!%p188_p2), %v2960_v4  ;;  %2935 = vmatprep.subr.bf16.mxu1 (!%p188_p2), %v2960_v4  ;;  %v3078_v30 = vrot.slane (!%p188_p2), %v3061_v24, %v896_v12  ;;  %v3100_v52 = vrot.slane (!%p188_p2), %v3061_v24, %v964_v31  ;;  %v3103_v53 = vrot.slane (!%p188_p2), %v3061_v24, %v1208_v32 }
   0xd   : > { %s4333_s19 = smov (!%p215_p3, %s2636_s19), 1  ;;  %v3106_v54 = vrot.slane %v3061_v24, %v1452_v33 }
   0xe   : > { %s2949_s26 = smul.u32 216, %s4333_s19  ;;  %s2689_s8 = sshll.u32 %s4333_s19, 7 }
   0xf   : > { %2890 = vmatpush3.bf16.msra.mxu0 %v2960_v4  ;;  %2943 = vmatpush3.bf16.msra.mxu1 %v2960_v4  ;;  %s4281_s19 = scalar_lea.vmem %s4331_s5, %s2689_s8 }
  0x10   : > { %s3036_s6 = scalar_lea.vmem %s4326_s0, %s2949_s26  ;;  %2891 = vmatprep.subr.bf16.mxu0 %v2961_v5  ;;  %2936 = vmatprep.subr.bf16.mxu1 %v2961_v5 }
  0x11   : > { %v2723_v9 = vld [vmem:[%s3036_s6] sm:$0xff]   ;;  %v228_v10 = vld [vmem:[%s3036_s6 + $0x8] sm:$0x1]  ;;  %v229_v11 = vld [vmem:[%s3036_s6 + $0xc] sm:$0xff]  }
  0x12   : > { %v2724_v13 = vunpack.c.l.bf16 %v2723_v9  ;;  %v2725_v14 = vunpack.c.h.bf16 %v2723_v9  ;;  %v231_v15 = vld [vmem:[%s3036_s6 + $0x14] sm:$0x1]  ;;  %v2838_v16 = vld [vmem:[%s3036_s6 + $0x18] sm:$0xff]   ;;  %v234_v17 = vld [vmem:[%s3036_s6 + $0x20] sm:$0x1]  ;;  %v282_v18 = vunpack.c.l.bf16 %v228_v10  ;;  %v3048_v19 = vunpack.c.l.bf16 %v229_v11 }
  0x13   : > { %v3050_v20 = vunpack.c.l.bf16 %v2838_v16  ;;  %v3052_v21 = vunpack.c.h.bf16 %v2838_v16  ;;  %v3054_v22 = vunpack.c.h.bf16 %v229_v11  ;;  %v3056_v23 = vunpack.c.l.bf16 %v231_v15  ;;  %2892 = vmatpush3.bf16.msra.mxu0 %v2961_v5  ;;  %2944 = vmatpush3.bf16.msra.mxu1 %v2961_v5  ;;  %v3109_v55 = vld [vmem:[%s3036_s6 + $0x60] sm:$0xff]   ;;  %v3134_v9 = vld [vmem:[%s4327_s1 + $0x8] ss:$0 sm:$0xff] }
  0x14   : > { %v3063_v25 = vunpack.c.l.bf16 %v234_v17  ;;  %v340_v34 = vmul.f32 %v2724_v13, %v3066_v26  ;;  %v341_v35 = vmul.f32 %v2725_v14, %v3066_v26  ;;  %v408_v36 = vmul.f32 %v2724_v13, %v3069_v27  ;;  %2893 = vmatprep.subr.bf16.mxu0 %v2962_v29  ;;  %2937 = vmatprep.subr.bf16.mxu1 %v2962_v29 }
  0x15   : > { %v409_v37 = vmul.f32 %v2725_v14, %v3069_v27  ;;  %v410_v38 = vmul.f32 %v3069_v27, %v282_v18  ;;  %v653_v39 = vmul.f32 %v2724_v13, %v3072_v28  ;;  %v654_v40 = vmul.f32 %v2725_v14, %v3072_v28 }
  0x16   : > { %v655_v41 = vmul.f32 %v3072_v28, %v282_v18  ;;  %v505_v42 = vrot.slane %v408_v36, 1  ;;  %v898_v44 = vmul.f32 %v3078_v30, %v3048_v19  ;;  %v899_v45 = vmul.f32 %v3078_v30, %v3054_v22  ;;  %v2965_v18 = vld [vmem:[%s4329_s3 + $0x38] sm:$0xff]  }
  0x17   : > { %v506_v43 = vrot.slane %v409_v37, 1  ;;  %v508_v47 = vrot.slane %v410_v38, 1  ;;  %v750_v48 = vrot.slane %v653_v39, 2  ;;  %v751_v49 = vrot.slane %v654_v40, 2  ;;  %2894 = vmatpush3.bf16.msra.mxu0 %v2962_v29  ;;  %2945 = vmatpush3.bf16.msra.mxu1 %v2962_v29 }
  0x18   : > { %v753_v50 = vrot.slane %v655_v41, 2  ;;  %v966_v61 = vmul.f32 %v3100_v52, %v3048_v19  ;;  %v967_v62 = vmul.f32 %v3100_v52, %v3054_v22  ;;  %2895 = vmatprep.subr.bf16.mxu0 %v2963_v46  ;;  %2938 = vmatprep.subr.bf16.mxu1 %v2963_v46  ;;  %v968_v2 = vmul.f32 %v3100_v52, %v3056_v23 }
  0x19   : > { %v507_v51 = vsel %vm504_vm0, %v505_v42, %v506_v43  ;;  %v509_v56 = vsel %vm504_vm0, %v506_v43, %v508_v47  ;;  %v752_v58 = vsel %vm749_vm1, %v750_v48, %v751_v49  ;;  %v1210_v4 = vmul.f32 %v3103_v53, %v3048_v19 }
  0x1a   : > { %v617_v57 = vadd.f32 %v507_v51, %v340_v34  ;;  %v754_v59 = vsel %vm749_vm1, %v751_v49, %v753_v50  ;;  %v618_v60 = vadd.f32 %v509_v56, %v341_v35  ;;  %v3127_v5 = vunpack.c.l.bf16 %v3109_v55  ;;  %v252_v50 = vld [vmem:[%s3036_s6 + $0x68] sm:$0x1]  ;;  %v253_v51 = vld [vmem:[%s3036_s6 + $0x6c] sm:$0xff]  }
  0x1b   : > { %v1062_v7 = vrot.slane %v966_v61, 1  ;;  %v1063_v8 = vrot.slane %v967_v62, 1  ;;  %v1211_v3 = vmul.f32 %v3103_v53, %v3054_v22  ;;  %v1065_v11 = vrot.slane %v968_v2, 1  ;;  %2896 = vmatpush3.bf16.msra.mxu0 %v2963_v46  ;;  %2946 = vmatpush3.bf16.msra.mxu1 %v2963_v46 }
  0x1c   : > { %v862_v1 = vadd.f32 %v752_v58, %v617_v57  ;;  %v863_v6 = vadd.f32 %v754_v59, %v618_v60  ;;  %v1212_v12 = vmul.f32 %v3103_v53, %v3056_v23  ;;  %v1306_v13 = vrot.slane %v1210_v4, 2  ;;  %2897 = vmatprep.subr.bf16.mxu0 %v2964_v0  ;;  %2939 = vmatprep.subr.bf16.mxu1 %v2964_v0  ;;  %v255_v60 = vld [vmem:[%s3036_s6 + $0x74] sm:$0x1] }
  0x1d   : > { %v1064_v15 = vsel %vm504_vm0, %v1062_v7, %v1063_v8  ;;  %v1307_v16 = vrot.slane %v1211_v3, 2  ;;  %v1454_v17 = vmul.f32 %v3050_v20, %v3106_v54  ;;  %v1066_v29 = vsel %vm504_vm0, %v1063_v8, %v1065_v11 }
  0x1e   : > { %v930_v10 = vadd.f32 %v898_v44, %v862_v1  ;;  %v931_v14 = vadd.f32 %v899_v45, %v863_v6  ;;  %v1309_v32 = vrot.slane %v1212_v12, 2  ;;  %v1455_v33 = vmul.f32 %v3052_v21, %v3106_v54  ;;  %v2842_v45 = vld [vmem:[%s3036_s6 + $0x78] sm:$0xff]   ;;  %v258_v1 = vld [vmem:[%s3036_s6 + $0x80] sm:$0x1] }
  0x1f   : > { %v1308_v35 = vsel %vm749_vm1, %v1306_v13, %v1307_v16  ;;  %v3149_v36 = vrot.slane %v3061_v24, %v1520_v63  ;;  %v1766_v37 = vmul.f32 %v3050_v20, %v3134_v9  ;;  %v1767_v40 = vmul.f32 %v3052_v21, %v3134_v9  ;;  %2898 = vmatpush3.bf16.msra.mxu0 %v2964_v0  ;;  %v3191_v12 = vld [vmem:[%s4328_s2] ss:$0 sm:$0xff] }
  0x20   : > { %v1174_v31 = vadd.f32 %v1064_v15, %v930_v10  ;;  %v1175_v34 = vadd.f32 %v1066_v29, %v931_v14  ;;  %v1310_v38 = vsel %vm749_vm1, %v1307_v16, %v1309_v32  ;;  %v1768_v41 = vmul.f32 %v3134_v9, %v3063_v25  ;;  %2947 = vmatpush3.bf16.msra.mxu1 %v2964_v0 }
  0x21   : > { %v1522_v24 = vmul.f32 %v3050_v20, %v3149_v36  ;;  %v1523_v43 = vmul.f32 %v3052_v21, %v3149_v36  ;;  %v1862_v44 = vrot.slane %v1766_v37, 2  ;;  %2899 = vmatprep.subr.bf16.mxu0 %v2965_v18  ;;  %2940 = vmatprep.subr.bf16.mxu1 %v2965_v18  ;;  %v1524_v47 = vmul.f32 %v3149_v36, %v3063_v25 }
  0x22   : > { %v1418_v39 = vadd.f32 %v1308_v35, %v1174_v31  ;;  %v1419_v42 = vadd.f32 %v1310_v38, %v1175_v34  ;;  %v1863_v48 = vrot.slane %v1767_v40, 2  ;;  %v1865_v49 = vrot.slane %v1768_v41, 2 }
  0x23   : > { %v1618_v57 = vrot.slane %v1522_v24, 1  ;;  %v1619_v58 = vrot.slane %v1523_v43, 1  ;;  %v3168_v59 = vunpack.c.h.bf16 %v3109_v55  ;;  %v1621_v61 = vrot.slane %v1524_v47, 1  ;;  %2900 = vmatpush3.bf16.msra.mxu0 %v2965_v18 }
  0x24   : > { %v1486_v46 = vadd.f32 %v1454_v17, %v1418_v39  ;;  %v1487_v56 = vadd.f32 %v1455_v33, %v1419_v42  ;;  %v1864_v62 = vsel %vm749_vm1, %v1862_v44, %v1863_v48  ;;  %v1866_v63 = vsel %vm749_vm1, %v1863_v48, %v1865_v49  ;;  %2948 = vmatpush3.bf16.msra.mxu1 %v2965_v18 }
  0x25   : > { %v3173_v0 = vunpack.c.l.bf16 %v2842_v45  ;;  %v1620_v2 = vsel %vm504_vm0, %v1618_v57, %v1619_v58  ;;  %v3177_v4 = vunpack.c.h.bf16 %v2842_v45  ;;  %v3179_v6 = vunpack.c.l.bf16 %v252_v50 }
  0x26   : > { %v3181_v7 = vunpack.c.l.bf16 %v253_v51  ;;  %v1622_v55 = vsel %vm504_vm0, %v1619_v58, %v1621_v61  ;;  %v1730_v8 = vadd.f32 %v1620_v2, %v1486_v46  ;;  %v3184_v3 = vunpack.c.h.bf16 %v253_v51 }
  0x27   : > { %v3186_v10 = vunpack.c.l.bf16 %v255_v60  ;;  %v1731_v11 = vadd.f32 %v1622_v55, %v1487_v56  ;;  %v3193_v13 = vunpack.c.l.bf16 %v258_v1  ;;  %v356_v14 = vmul.f32 %v3127_v5, %v3066_v26 }
  0x28   : > { %v357_v15 = vmul.f32 %v3168_v59, %v3066_v26  ;;  %v1974_v16 = vadd.f32 %v1864_v62, %v1730_v8  ;;  %v432_v17 = vmul.f32 %v3127_v5, %v3069_v27  ;;  %v433_v18 = vmul.f32 %v3168_v59, %v3069_v27 }
  0x29   : > { %v434_v29 = vmul.f32 %v3069_v27, %v3179_v6  ;;  %v1975_v31 = vadd.f32 %v1866_v63, %v1731_v11  ;;  %v677_v32 = vmul.f32 %v3127_v5, %v3072_v28  ;;  %v678_v33 = vmul.f32 %v3168_v59, %v3072_v28 }
  0x2a   : > { %v679_v34 = vmul.f32 %v3072_v28, %v3179_v6  ;;  %v2013_v35 = vadd.f32 %v3191_v12, %v1974_v16  ;;  %v545_v37 = vrot.slane %v432_v17, 1  ;;  %v546_v38 = vrot.slane %v433_v18, 1 }
  0x2b   : > { %v548_v39 = vrot.slane %v434_v29, 1  ;;  %v2014_v40 = vadd.f32 %v3191_v12, %v1975_v31  ;;  %v790_v41 = vrot.slane %v677_v32, 2  ;;  %v791_v42 = vrot.slane %v678_v33, 2 }
  0x2c   : > { %v793_v24 = vrot.slane %v679_v34, 2  ;;  %v2045_v43 = vmax.f32 %v2013_v35, 0.0  ;;  %v547_v44 = vsel %vm504_vm0, %v545_v37, %v546_v38  ;;  %v914_v46 = vmul.f32 %v3078_v30, %v3181_v7 }
  0x2d   : > { %v549_v45 = vsel %vm504_vm0, %v546_v38, %v548_v39  ;;  %v2046_v47 = vmax.f32 %v2014_v40, 0.0  ;;  %v633_v48 = vadd.f32 %v547_v44, %v356_v14  ;;  %v792_v50 = vsel %vm749_vm1, %v790_v41, %v791_v42  ;;  %v235_v44 = vld [vmem:[%s3036_s6 + $0x24] sm:$0xff]  }
  0x2e   : > { %v634_v49 = vadd.f32 %v549_v45, %v357_v15  ;;  %v2077_v51 = vmin.f32 %v2045_v43, 6.0  ;;  %v794_v56 = vsel %vm749_vm1, %v791_v42, %v793_v24  ;;  %v915_v57 = vmul.f32 %v3078_v30, %v3184_v3 }
  0x2f   : > { %v990_v58 = vmul.f32 %v3100_v52, %v3181_v7  ;;  %v2078_v60 = vmin.f32 %v2046_v47, 6.0  ;;  %v878_v61 = vadd.f32 %v792_v50, %v633_v48  ;;  %v991_v63 = vmul.f32 %v3100_v52, %v3184_v3 }
  0x30   : > { %v879_v62 = vadd.f32 %v794_v56, %v634_v49  ;;  %v992_v1 = vmul.f32 %v3100_v52, %v3186_v10  ;;  %v1234_v55 = vmul.f32 %v3103_v53, %v3181_v7  ;;  %v1235_v8 = vmul.f32 %v3103_v53, %v3184_v3 }
  0x31   : > { %v1102_v2 = vrot.slane %v990_v58, 1  ;;  %v2109_v11 = vpack.c.bf16 %v2078_v60, %v2077_v51  ;;  %v946_v14 = vadd.f32 %v914_v46, %v878_v61  ;;  %v1103_v16 = vrot.slane %v991_v63, 1 }
  0x32   : > { %v947_v15 = vadd.f32 %v915_v57, %v879_v62  ;;  %v1105_v17 = vrot.slane %v992_v1, 1  ;;  %v1236_v18 = vmul.f32 %v3103_v53, %v3186_v10  ;;  %v1346_v29 = vrot.slane %v1234_v55, 2  ;;  %v237_v57 = vld [vmem:[%s3036_s6 + $0x2c] sm:$0x1] }
  0x33   : > { %v1347_v31 = vrot.slane %v1235_v8, 2  ;;  %2901 = vmatprep.mubr.bf16.mxu0 %v2109_v11  ;;  %v1104_v32 = vsel %vm504_vm0, %v1102_v2, %v1103_v16  ;;  %v1470_v33 = vmul.f32 %v3173_v0, %v3106_v54  ;;  %v1471_v34 = vmul.f32 %v3177_v4, %v3106_v54 }
  0x34   : > { %v1546_v35 = vmul.f32 %v3173_v0, %v3149_v36  ;;  %v1106_v37 = vsel %vm504_vm0, %v1103_v16, %v1105_v17  ;;  %v1190_v38 = vadd.f32 %v1104_v32, %v946_v14  ;;  %v1349_v40 = vrot.slane %v1236_v18, 2 }
  0x35   : > { %v1348_v39 = vsel %vm749_vm1, %v1346_v29, %v1347_v31  ;;  %v1191_v41 = vadd.f32 %v1106_v37, %v947_v15  ;;  %v1547_v42 = vmul.f32 %v3177_v4, %v3149_v36  ;;  %v1548_v24 = vmul.f32 %v3149_v36, %v3193_v13 }
  0x36   : > { %v1658_v43 = vrot.slane %v1546_v35, 1  ;;  %v1350_v45 = vsel %vm749_vm1, %v1347_v31, %v1349_v40  ;;  %v1434_v46 = vadd.f32 %v1348_v39, %v1190_v38  ;;  %v1790_v47 = vmul.f32 %v3173_v0, %v3134_v9 }
  0x37   : > { %v1791_v48 = vmul.f32 %v3177_v4, %v3134_v9  ;;  %v1435_v49 = vadd.f32 %v1350_v45, %v1191_v41  ;;  %v1659_v50 = vrot.slane %v1547_v42, 1  ;;  %v1661_v51 = vrot.slane %v1548_v24, 1 }
  0x38   : > { %v1792_v56 = vmul.f32 %v3134_v9, %v3193_v13  ;;  %v1502_v58 = vadd.f32 %v1470_v33, %v1434_v46  ;;  %v1902_v60 = vrot.slane %v1790_v47, 2  ;;  %v3255_v62 = vunpack.c.l.bf16 %v235_v44 }
  0x39   : > { %v1903_v61 = vrot.slane %v1791_v48, 2  ;;  %v1503_v63 = vadd.f32 %v1471_v34, %v1435_v49  ;;  %v1660_v1 = vsel %vm504_vm0, %v1658_v43, %v1659_v50  ;;  %v1662_v2 = vsel %vm504_vm0, %v1659_v50, %v1661_v51 }
  0x3a   : > { %v1905_v55 = vrot.slane %v1792_v56, 2  ;;  %v1746_v8 = vadd.f32 %v1660_v1, %v1502_v58  ;;  %v3260_v14 = vunpack.c.h.bf16 %v235_v44  ;;  %v3262_v15 = vunpack.c.l.bf16 %v237_v57 }
  0x3b   : > { %v1904_v11 = vsel %vm749_vm1, %v1902_v60, %v1903_v61  ;;  %v1747_v16 = vadd.f32 %v1662_v2, %v1503_v63  ;;  %v342_v18 = vmul.f32 %v3066_v26, %v3048_v19  ;;  %v343_v29 = vmul.f32 %v3066_v26, %v3054_v22 }
  0x3c   : > { %v1906_v17 = vsel %vm749_vm1, %v1903_v61, %v1905_v55  ;;  %v1990_v31 = vadd.f32 %v1904_v11, %v1746_v8  ;;  %v411_v32 = vmul.f32 %v3069_v27, %v3048_v19  ;;  %v412_v33 = vmul.f32 %v3069_v27, %v3054_v22 }
  0x3d   : > { %v413_v34 = vmul.f32 %v3069_v27, %v3056_v23  ;;  %v1991_v35 = vadd.f32 %v1906_v17, %v1747_v16  ;;  %v656_v37 = vmul.f32 %v3072_v28, %v3048_v19  ;;  %v657_v38 = vmul.f32 %v3072_v28, %v3054_v22 }
  0x3e   : > { %v658_v39 = vmul.f32 %v3072_v28, %v3056_v23  ;;  %v2029_v40 = vadd.f32 %v3191_v12, %v1990_v31  ;;  %v510_v41 = vrot.slane %v411_v32, 1  ;;  %v511_v42 = vrot.slane %v412_v33, 1 }
  0x3f   : > { %v513_v24 = vrot.slane %v413_v34, 1  ;;  %v2030_v43 = vadd.f32 %v3191_v12, %v1991_v35  ;;  %v755_v44 = vrot.slane %v656_v37, 2  ;;  %v756_v45 = vrot.slane %v657_v38, 2 }
  0x40   : > { %v758_v46 = vrot.slane %v658_v39, 2  ;;  %v2061_v47 = vmax.f32 %v2029_v40, 0.0  ;;  %v512_v48 = vsel %vm504_vm0, %v510_v41, %v511_v42  ;;  %v900_v22 = vmul.f32 %v3050_v20, %v3078_v30 }
  0x41   : > { %v514_v19 = vsel %vm504_vm0, %v511_v42, %v513_v24  ;;  %v2062_v49 = vmax.f32 %v2030_v43, 0.0  ;;  %v619_v23 = vadd.f32 %v512_v48, %v342_v18  ;;  %v757_v51 = vsel %vm749_vm1, %v755_v44, %v756_v45  ;;  %v259_v48 = vld [vmem:[%s3036_s6 + $0x84] sm:$0xff]  }
  0x42   : > { %v620_v50 = vadd.f32 %v514_v19, %v343_v29  ;;  %v2093_v56 = vmin.f32 %v2061_v47, 6.0  ;;  %v759_v57 = vsel %vm749_vm1, %v756_v45, %v758_v46  ;;  %v901_v58 = vmul.f32 %v3052_v21, %v3078_v30 }
  0x43   : > { %v969_v60 = vmul.f32 %v3050_v20, %v3100_v52  ;;  %v2094_v61 = vmin.f32 %v2062_v49, 6.0  ;;  %v864_v63 = vadd.f32 %v757_v51, %v619_v23  ;;  %v970_v2 = vmul.f32 %v3052_v21, %v3100_v52 }
  0x44   : > { %v865_v1 = vadd.f32 %v759_v57, %v620_v50  ;;  %v971_v55 = vmul.f32 %v3100_v52, %v3063_v25  ;;  %v1213_v11 = vmul.f32 %v3050_v20, %v3103_v53  ;;  %v1214_v16 = vmul.f32 %v3052_v21, %v3103_v53 }
  0x45   : > { %v1067_v8 = vrot.slane %v969_v60, 1  ;;  %v2117_v17 = vpack.c.bf16 %v2094_v61, %v2093_v56  ;;  %v932_v18 = vadd.f32 %v900_v22, %v864_v63  ;;  %v1068_v31 = vrot.slane %v970_v2, 1 }
  0x46   : > { %v933_v29 = vadd.f32 %v901_v58, %v865_v1  ;;  %v1070_v32 = vrot.slane %v971_v55, 1  ;;  %v1215_v33 = vmul.f32 %v3103_v53, %v3063_v25  ;;  %v1311_v34 = vrot.slane %v1213_v11, 2  ;;  %v261_v58 = vld [vmem:[%s3036_s6 + $0x8c] sm:$0x1] }
  0x47   : > { %v1312_v35 = vrot.slane %v1214_v16, 2  ;;  %2917 = vmatprep.mubr.bf16.mxu1 %v2117_v17  ;;  %v1069_v37 = vsel %vm504_vm0, %v1067_v8, %v1068_v31  ;;  %v1456_v38 = vmul.f32 %v3106_v54, %v3255_v62  ;;  %v1457_v39 = vmul.f32 %v3106_v54, %v3260_v14 }
  0x48   : > { %v1525_v40 = vmul.f32 %v3149_v36, %v3255_v62  ;;  %v1071_v41 = vsel %vm504_vm0, %v1068_v31, %v1070_v32  ;;  %v1176_v42 = vadd.f32 %v1069_v37, %v932_v18  ;;  %v1314_v43 = vrot.slane %v1215_v33, 2 }
  0x49   : > { %v1313_v24 = vsel %vm749_vm1, %v1311_v34, %v1312_v35  ;;  %v1177_v44 = vadd.f32 %v1071_v41, %v933_v29  ;;  %v1526_v45 = vmul.f32 %v3149_v36, %v3260_v14  ;;  %v1527_v46 = vmul.f32 %v3149_v36, %v3262_v15 }
  0x4a   : > { %v1623_v47 = vrot.slane %v1525_v40, 1  ;;  %v1315_v19 = vsel %vm749_vm1, %v1312_v35, %v1314_v43  ;;  %v1420_v22 = vadd.f32 %v1313_v24, %v1176_v42  ;;  %v1769_v49 = vmul.f32 %v3134_v9, %v3255_v62 }
  0x4b   : > { %v1770_v23 = vmul.f32 %v3134_v9, %v3260_v14  ;;  %v1421_v50 = vadd.f32 %v1315_v19, %v1177_v44  ;;  %v1624_v51 = vrot.slane %v1526_v45, 1  ;;  %v1626_v56 = vrot.slane %v1527_v46, 1 }
  0x4c   : > { %v1771_v57 = vmul.f32 %v3134_v9, %v3262_v15  ;;  %v1488_v60 = vadd.f32 %v1456_v38, %v1420_v22  ;;  %v1867_v61 = vrot.slane %v1769_v49, 2  ;;  %v3325_v1 = vunpack.c.l.bf16 %v259_v48 }
  0x4d   : > { %v1868_v63 = vrot.slane %v1770_v23, 2  ;;  %v1489_v2 = vadd.f32 %v1457_v39, %v1421_v50  ;;  %v1625_v55 = vsel %vm504_vm0, %v1623_v47, %v1624_v51  ;;  %v1627_v8 = vsel %vm504_vm0, %v1624_v51, %v1626_v56 }
  0x4e   : > { %v1870_v11 = vrot.slane %v1771_v57, 2  ;;  %v1732_v16 = vadd.f32 %v1625_v55, %v1488_v60  ;;  %v3330_v18 = vunpack.c.h.bf16 %v259_v48  ;;  %v3332_v29 = vunpack.c.l.bf16 %v261_v58 }
  0x4f   : > { %v1869_v17 = vsel %vm749_vm1, %v1867_v61, %v1868_v63  ;;  %v1733_v31 = vadd.f32 %v1627_v8, %v1489_v2  ;;  %v358_v33 = vmul.f32 %v3066_v26, %v3181_v7  ;;  %v359_v34 = vmul.f32 %v3066_v26, %v3184_v3 }
  0x50   : > { %v1871_v32 = vsel %vm749_vm1, %v1868_v63, %v1870_v11  ;;  %v1976_v35 = vadd.f32 %v1869_v17, %v1732_v16  ;;  %v435_v37 = vmul.f32 %v3069_v27, %v3181_v7  ;;  %v436_v38 = vmul.f32 %v3069_v27, %v3184_v3 }
  0x51   : > { %v437_v39 = vmul.f32 %v3069_v27, %v3186_v10  ;;  %v1977_v40 = vadd.f32 %v1871_v32, %v1733_v31  ;;  %v680_v41 = vmul.f32 %v3072_v28, %v3181_v7  ;;  %v681_v42 = vmul.f32 %v3072_v28, %v3184_v3 }
  0x52   : > { %v682_v24 = vmul.f32 %v3072_v28, %v3186_v10  ;;  %v2015_v43 = vadd.f32 %v3191_v12, %v1976_v35  ;;  %v550_v44 = vrot.slane %v435_v37, 1  ;;  %v551_v45 = vrot.slane %v436_v38, 1 }
  0x53   : > { %v553_v46 = vrot.slane %v437_v39, 1  ;;  %v2016_v47 = vadd.f32 %v3191_v12, %v1977_v40  ;;  %v795_v48 = vrot.slane %v680_v41, 2  ;;  %v796_v19 = vrot.slane %v681_v42, 2 }
  0x54   : > { %v798_v22 = vrot.slane %v682_v24, 2  ;;  %v2047_v49 = vmax.f32 %v2015_v43, 0.0  ;;  %v552_v23 = vsel %vm504_vm0, %v550_v44, %v551_v45  ;;  %v916_v51 = vmul.f32 %v3173_v0, %v3078_v30 }
  0x55   : > { %v554_v50 = vsel %vm504_vm0, %v551_v45, %v553_v46  ;;  %v2048_v56 = vmax.f32 %v2016_v47, 0.0  ;;  %v635_v57 = vadd.f32 %v552_v23, %v358_v33  ;;  %v797_v60 = vsel %vm749_vm1, %v795_v48, %v796_v19 }
  0x56   : > { %v636_v58 = vadd.f32 %v554_v50, %v359_v34  ;;  %v2079_v61 = vmin.f32 %v2047_v49, 6.0  ;;  %v799_v63 = vsel %vm749_vm1, %v796_v19, %v798_v22  ;;  %v917_v2 = vmul.f32 %v3177_v4, %v3078_v30 }
  0x57   : > { %v993_v55 = vmul.f32 %v3173_v0, %v3100_v52  ;;  %v2080_v8 = vmin.f32 %v2048_v56, 6.0  ;;  %v880_v11 = vadd.f32 %v797_v60, %v635_v57  ;;  %v994_v17 = vmul.f32 %v3177_v4, %v3100_v52  ;;  %v2839_v56 = vld [vmem:[%s3036_s6 + $0x30] sm:$0xff]  }
  0x58   : > { %v881_v16 = vadd.f32 %v799_v63, %v636_v58  ;;  %v995_v31 = vmul.f32 %v3100_v52, %v3193_v13  ;;  %v1237_v33 = vmul.f32 %v3173_v0, %v3103_v53  ;;  %v1238_v34 = vmul.f32 %v3177_v4, %v3103_v53 }
  0x59   : > { %v1107_v32 = vrot.slane %v993_v55, 1  ;;  %v2110_v35 = vpack.c.bf16 %v2080_v8, %v2079_v61  ;;  %v948_v37 = vadd.f32 %v916_v51, %v880_v11  ;;  %v1108_v39 = vrot.slane %v994_v17, 1  ;;  %v240_v11 = vld [vmem:[%s3036_s6 + $0x38] sm:$0x1] }
  0x5a   : > { %v949_v38 = vadd.f32 %v917_v2, %v881_v16  ;;  %v1110_v40 = vrot.slane %v995_v31, 1  ;;  %v1239_v41 = vmul.f32 %v3103_v53, %v3193_v13  ;;  %v1351_v42 = vrot.slane %v1237_v33, 2 }
  0x5b   : > { %v1352_v24 = vrot.slane %v1238_v34, 2  ;;  %2902 = vmatmul.mubr.bf16.vlgmr.msra.gmra.mrb[0].mxu0 %v2110_v35  ;;  %v1109_v43 = vsel %vm504_vm0, %v1107_v32, %v1108_v39  ;;  %v1472_v44 = vmul.f32 %v3106_v54, %v3325_v1  ;;  %v1473_v45 = vmul.f32 %v3106_v54, %v3330_v18 }
  0x5c   : > { %v1549_v46 = vmul.f32 %v3149_v36, %v3325_v1  ;;  %v1111_v47 = vsel %vm504_vm0, %v1108_v39, %v1110_v40  ;;  %v1192_v48 = vadd.f32 %v1109_v43, %v948_v37  ;;  %v1354_v22 = vrot.slane %v1239_v41, 2 }
  0x5d   : > { %v1353_v19 = vsel %vm749_vm1, %v1351_v42, %v1352_v24  ;;  %v1193_v49 = vadd.f32 %v1111_v47, %v949_v38  ;;  %v1550_v23 = vmul.f32 %v3149_v36, %v3330_v18  ;;  %v1551_v50 = vmul.f32 %v3149_v36, %v3332_v29 }
  0x5e   : > { %v1663_v51 = vrot.slane %v1549_v46, 1  ;;  %v1355_v57 = vsel %vm749_vm1, %v1352_v24, %v1354_v22  ;;  %v1436_v58 = vadd.f32 %v1353_v19, %v1192_v48  ;;  %v1793_v60 = vmul.f32 %v3134_v9, %v3325_v1 }
  0x5f   : > { %v1794_v61 = vmul.f32 %v3134_v9, %v3330_v18  ;;  %v1437_v63 = vadd.f32 %v1355_v57, %v1193_v49  ;;  %v1664_v2 = vrot.slane %v1550_v23, 1  ;;  %v1666_v55 = vrot.slane %v1551_v50, 1 }
  0x60   : > { %v1795_v8 = vmul.f32 %v3134_v9, %v3332_v29  ;;  %v1504_v16 = vadd.f32 %v1472_v44, %v1436_v58  ;;  %v1907_v17 = vrot.slane %v1793_v60, 2  ;;  %v3395_v32 = vunpack.c.l.bf16 %v2839_v56 }
  0x61   : > { %v1908_v31 = vrot.slane %v1794_v61, 2  ;;  %v1505_v33 = vadd.f32 %v1473_v45, %v1437_v63  ;;  %v1665_v34 = vsel %vm504_vm0, %v1663_v51, %v1664_v2  ;;  %v1667_v35 = vsel %vm504_vm0, %v1664_v2, %v1666_v55 }
  0x62   : > { %v1910_v37 = vrot.slane %v1795_v8, 2  ;;  %v1748_v38 = vadd.f32 %v1665_v34, %v1504_v16  ;;  %v3400_v40 = vunpack.c.h.bf16 %v2839_v56  ;;  %v3402_v41 = vunpack.c.l.bf16 %v240_v11 }
  0x63   : > { %v1909_v39 = vsel %vm749_vm1, %v1907_v17, %v1908_v31  ;;  %v1749_v42 = vadd.f32 %v1667_v35, %v1505_v33  ;;  %v344_v43 = vmul.f32 %v3050_v20, %v3066_v26  ;;  %v345_v44 = vmul.f32 %v3052_v21, %v3066_v26 }
  0x64   : > { %v1911_v24 = vsel %vm749_vm1, %v1908_v31, %v1910_v37  ;;  %v1992_v45 = vadd.f32 %v1909_v39, %v1748_v38  ;;  %v414_v46 = vmul.f32 %v3050_v20, %v3069_v27  ;;  %v415_v47 = vmul.f32 %v3052_v21, %v3069_v27 }
  0x65   : > { %v416_v48 = vmul.f32 %v3069_v27, %v3063_v25  ;;  %v1993_v19 = vadd.f32 %v1911_v24, %v1749_v42  ;;  %v659_v22 = vmul.f32 %v3050_v20, %v3072_v28  ;;  %v660_v49 = vmul.f32 %v3052_v21, %v3072_v28 }
  0x66   : > { %v661_v23 = vmul.f32 %v3072_v28, %v3063_v25  ;;  %v2031_v50 = vadd.f32 %v3191_v12, %v1992_v45  ;;  %v515_v51 = vrot.slane %v414_v46, 1  ;;  %v516_v56 = vrot.slane %v415_v47, 1 }
  0x67   : > { %v518_v57 = vrot.slane %v416_v48, 1  ;;  %v2032_v58 = vadd.f32 %v3191_v12, %v1993_v19  ;;  %v760_v60 = vrot.slane %v659_v22, 2  ;;  %v761_v61 = vrot.slane %v660_v49, 2 }
  0x68   : > { %v763_v63 = vrot.slane %v661_v23, 2  ;;  %v2063_v2 = vmax.f32 %v2031_v50, 0.0  ;;  %v517_v55 = vsel %vm504_vm0, %v515_v51, %v516_v56  ;;  %v902_v21 = vmul.f32 %v3078_v30, %v3255_v62 }
  0x69   : > { %v519_v20 = vsel %vm504_vm0, %v516_v56, %v518_v57  ;;  %v2064_v8 = vmax.f32 %v2032_v58, 0.0  ;;  %v621_v25 = vadd.f32 %v517_v55, %v344_v43  ;;  %v762_v16 = vsel %vm749_vm1, %v760_v60, %v761_v61 }
  0x6a   : > { %v622_v11 = vadd.f32 %v519_v20, %v345_v44  ;;  %v2095_v17 = vmin.f32 %v2063_v2, 6.0  ;;  %v764_v31 = vsel %vm749_vm1, %v761_v61, %v763_v63  ;;  %v903_v33 = vmul.f32 %v3078_v30, %v3260_v14 }
  0x6b   : > { %v972_v34 = vmul.f32 %v3100_v52, %v3255_v62  ;;  %v2096_v35 = vmin.f32 %v2064_v8, 6.0  ;;  %v866_v37 = vadd.f32 %v762_v16, %v621_v25  ;;  %v973_v39 = vmul.f32 %v3100_v52, %v3260_v14  ;;  %v2843_v8 = vld [vmem:[%s3036_s6 + $0x90] sm:$0xff]  }
  0x6c   : > { %v867_v38 = vadd.f32 %v764_v31, %v622_v11  ;;  %v974_v42 = vmul.f32 %v3100_v52, %v3262_v15  ;;  %v1216_v43 = vmul.f32 %v3103_v53, %v3255_v62  ;;  %v1217_v44 = vmul.f32 %v3103_v53, %v3260_v14 }
  0x6d   : > { %v1072_v24 = vrot.slane %v972_v34, 1  ;;  %v2118_v45 = vpack.c.bf16 %v2096_v35, %v2095_v17  ;;  %v934_v46 = vadd.f32 %v902_v21, %v866_v37  ;;  %v1073_v48 = vrot.slane %v973_v39, 1  ;;  %v264_v37 = vld [vmem:[%s3036_s6 + $0x98] sm:$0x1] }
  0x6e   : > { %v935_v47 = vadd.f32 %v903_v33, %v867_v38  ;;  %v1075_v19 = vrot.slane %v974_v42, 1  ;;  %v1218_v22 = vmul.f32 %v3103_v53, %v3262_v15  ;;  %v1316_v49 = vrot.slane %v1216_v43, 2 }
  0x6f   : > { %v1317_v23 = vrot.slane %v1217_v44, 2  ;;  %2918 = vmatmul.mubr.bf16.vlgmr.msra.gmra.mrb[0].mxu1 %v2118_v45  ;;  %v1074_v50 = vsel %vm504_vm0, %v1072_v24, %v1073_v48  ;;  %v1458_v51 = vmul.f32 %v3395_v32, %v3106_v54  ;;  %v1459_v56 = vmul.f32 %v3400_v40, %v3106_v54 }
  0x70   : > { %v1528_v57 = vmul.f32 %v3395_v32, %v3149_v36  ;;  %v1076_v58 = vsel %vm504_vm0, %v1073_v48, %v1075_v19  ;;  %v1178_v60 = vadd.f32 %v1074_v50, %v934_v46  ;;  %v1319_v63 = vrot.slane %v1218_v22, 2 }
  0x71   : > { %v1318_v61 = vsel %vm749_vm1, %v1316_v49, %v1317_v23  ;;  %v1179_v2 = vadd.f32 %v1076_v58, %v935_v47  ;;  %v1529_v55 = vmul.f32 %v3400_v40, %v3149_v36  ;;  %v1530_v20 = vmul.f32 %v3149_v36, %v3402_v41 }
  0x72   : > { %v1628_v21 = vrot.slane %v1528_v57, 1  ;;  %v1320_v25 = vsel %vm749_vm1, %v1317_v23, %v1319_v63  ;;  %v1422_v11 = vadd.f32 %v1318_v61, %v1178_v60  ;;  %v1772_v16 = vmul.f32 %v3395_v32, %v3134_v9 }
  0x73   : > { %v1773_v17 = vmul.f32 %v3400_v40, %v3134_v9  ;;  %v1423_v31 = vadd.f32 %v1320_v25, %v1179_v2  ;;  %v1629_v33 = vrot.slane %v1529_v55, 1  ;;  %v1631_v34 = vrot.slane %v1530_v20, 1 }
  0x74   : > { %v1774_v35 = vmul.f32 %v3134_v9, %v3402_v41  ;;  %v1490_v38 = vadd.f32 %v1458_v51, %v1422_v11  ;;  %v1872_v39 = vrot.slane %v1772_v16, 2  ;;  %v3465_v24 = vunpack.c.l.bf16 %v2843_v8 }
  0x75   : > { %v1873_v42 = vrot.slane %v1773_v17, 2  ;;  %v1491_v43 = vadd.f32 %v1459_v56, %v1423_v31  ;;  %v1630_v44 = vsel %vm504_vm0, %v1628_v21, %v1629_v33  ;;  %v1632_v45 = vsel %vm504_vm0, %v1629_v33, %v1631_v34 }
  0x76   : > { %v1875_v46 = vrot.slane %v1774_v35, 2  ;;  %v1734_v47 = vadd.f32 %v1630_v44, %v1490_v38  ;;  %v3470_v19 = vunpack.c.h.bf16 %v2843_v8  ;;  %v3472_v22 = vunpack.c.l.bf16 %v264_v37 }
  0x77   : > { %v1874_v48 = vsel %vm749_vm1, %v1872_v39, %v1873_v42  ;;  %v1735_v49 = vadd.f32 %v1632_v45, %v1491_v43  ;;  %v360_v50 = vmul.f32 %v3173_v0, %v3066_v26  ;;  %v361_v51 = vmul.f32 %v3177_v4, %v3066_v26 }
  0x78   : > { %v1876_v23 = vsel %vm749_vm1, %v1873_v42, %v1875_v46  ;;  %v1978_v56 = vadd.f32 %v1874_v48, %v1734_v47  ;;  %v438_v57 = vmul.f32 %v3173_v0, %v3069_v27  ;;  %v439_v58 = vmul.f32 %v3177_v4, %v3069_v27 }
  0x79   : > { %v440_v60 = vmul.f32 %v3069_v27, %v3193_v13  ;;  %v1979_v61 = vadd.f32 %v1876_v23, %v1735_v49  ;;  %v683_v63 = vmul.f32 %v3173_v0, %v3072_v28  ;;  %v684_v2 = vmul.f32 %v3177_v4, %v3072_v28 }
  0x7a   : > { %v685_v55 = vmul.f32 %v3072_v28, %v3193_v13  ;;  %v2017_v20 = vadd.f32 %v3191_v12, %v1978_v56  ;;  %v555_v21 = vrot.slane %v438_v57, 1  ;;  %v556_v8 = vrot.slane %v439_v58, 1 }
  0x7b   : > { %v558_v25 = vrot.slane %v440_v60, 1  ;;  %v2018_v11 = vadd.f32 %v3191_v12, %v1979_v61  ;;  %v800_v16 = vrot.slane %v683_v63, 2  ;;  %v801_v17 = vrot.slane %v684_v2, 2 }
  0x7c   : > { %v803_v31 = vrot.slane %v685_v55, 2  ;;  %v2049_v33 = vmax.f32 %v2017_v20, 0.0  ;;  %v557_v34 = vsel %vm504_vm0, %v555_v21, %v556_v8  ;;  %v918_v4 = vmul.f32 %v3078_v30, %v3325_v1 }
  0x7d   : > { %v559_v0 = vsel %vm504_vm0, %v556_v8, %v558_v25  ;;  %v2050_v35 = vmax.f32 %v2018_v11, 0.0  ;;  %v637_v13 = vadd.f32 %v557_v34, %v360_v50  ;;  %v802_v38 = vsel %vm749_vm1, %v800_v16, %v801_v17 }
  0x7e   : > { %v638_v37 = vadd.f32 %v559_v0, %v361_v51  ;;  %v2081_v39 = vmin.f32 %v2049_v33, 6.0  ;;  %v804_v42 = vsel %vm749_vm1, %v801_v17, %v803_v31  ;;  %v919_v43 = vmul.f32 %v3078_v30, %v3330_v18 }
  0x7f   : > { %v996_v44 = vmul.f32 %v3100_v52, %v3325_v1  ;;  %v2082_v45 = vmin.f32 %v2050_v35, 6.0  ;;  %v882_v46 = vadd.f32 %v802_v38, %v637_v13  ;;  %v997_v48 = vmul.f32 %v3100_v52, %v3330_v18  ;;  %v241_v35 = vld [vmem:[%s3036_s6 + $0x3c] sm:$0xff]  }
  0x80   : > { %v883_v47 = vadd.f32 %v804_v42, %v638_v37  ;;  %v998_v49 = vmul.f32 %v3100_v52, %v3332_v29  ;;  %v1240_v50 = vmul.f32 %v3103_v53, %v3325_v1  ;;  %v1241_v51 = vmul.f32 %v3103_v53, %v3330_v18 }
  0x81   : > { %v1112_v23 = vrot.slane %v996_v44, 1  ;;  %v2111_v56 = vpack.c.bf16 %v2082_v45, %v2081_v39  ;;  %v950_v57 = vadd.f32 %v918_v4, %v882_v46  ;;  %v1113_v60 = vrot.slane %v997_v48, 1  ;;  %v243_v46 = vld [vmem:[%s3036_s6 + $0x44] sm:$0x1] }
  0x82   : > { %v951_v58 = vadd.f32 %v919_v43, %v883_v47  ;;  %v1115_v61 = vrot.slane %v998_v49, 1  ;;  %v1242_v63 = vmul.f32 %v3103_v53, %v3332_v29  ;;  %v1356_v2 = vrot.slane %v1240_v50, 2 }
  0x83   : > { %v1357_v55 = vrot.slane %v1241_v51, 2  ;;  %2905 = vmatprep.mubr.bf16.mxu0 %v2111_v56  ;;  %v1114_v20 = vsel %vm504_vm0, %v1112_v23, %v1113_v60  ;;  %v1474_v21 = vmul.f32 %v3465_v24, %v3106_v54  ;;  %v1475_v8 = vmul.f32 %v3470_v19, %v3106_v54 }
  0x84   : > { %v1552_v25 = vmul.f32 %v3465_v24, %v3149_v36  ;;  %v1116_v11 = vsel %vm504_vm0, %v1113_v60, %v1115_v61  ;;  %v1194_v16 = vadd.f32 %v1114_v20, %v950_v57  ;;  %v1359_v31 = vrot.slane %v1242_v63, 2 }
  0x85   : > { %v1358_v17 = vsel %vm749_vm1, %v1356_v2, %v1357_v55  ;;  %v1195_v33 = vadd.f32 %v1116_v11, %v951_v58  ;;  %v1553_v34 = vmul.f32 %v3470_v19, %v3149_v36  ;;  %v1554_v0 = vmul.f32 %v3149_v36, %v3472_v22 }
  0x86   : > { %v1668_v4 = vrot.slane %v1552_v25, 1  ;;  %v1360_v13 = vsel %vm749_vm1, %v1357_v55, %v1359_v31  ;;  %v1438_v37 = vadd.f32 %v1358_v17, %v1194_v16  ;;  %v1796_v38 = vmul.f32 %v3465_v24, %v3134_v9 }
  0x87   : > { %v1797_v39 = vmul.f32 %v3470_v19, %v3134_v9  ;;  %v1439_v42 = vadd.f32 %v1360_v13, %v1195_v33  ;;  %v1669_v43 = vrot.slane %v1553_v34, 1  ;;  %v1671_v44 = vrot.slane %v1554_v0, 1 }
  0x88   : > { %v1798_v45 = vmul.f32 %v3134_v9, %v3472_v22  ;;  %v1506_v47 = vadd.f32 %v1474_v21, %v1438_v37  ;;  %v1912_v48 = vrot.slane %v1796_v38, 2  ;;  %v3535_v23 = vunpack.c.l.bf16 %v241_v35 }
  0x89   : > { %v1913_v49 = vrot.slane %v1797_v39, 2  ;;  %v1507_v50 = vadd.f32 %v1475_v8, %v1439_v42  ;;  %v1670_v51 = vsel %vm504_vm0, %v1668_v4, %v1669_v43  ;;  %v1672_v56 = vsel %vm504_vm0, %v1669_v43, %v1671_v44 }
  0x8a   : > { %v1915_v57 = vrot.slane %v1798_v45, 2  ;;  %v1750_v58 = vadd.f32 %v1670_v51, %v1506_v47  ;;  %v3540_v61 = vunpack.c.h.bf16 %v241_v35  ;;  %v3542_v63 = vunpack.c.l.bf16 %v243_v46 }
  0x8b   : > { %v1914_v60 = vsel %vm749_vm1, %v1912_v48, %v1913_v49  ;;  %v1751_v9 = vadd.f32 %v1672_v56, %v1507_v50  ;;  %v346_v55 = vmul.f32 %v3066_v26, %v3255_v62  ;;  %v347_v20 = vmul.f32 %v3066_v26, %v3260_v14 }
  0x8c   : > { %v1916_v2 = vsel %vm749_vm1, %v1913_v49, %v1915_v57  ;;  %v1994_v21 = vadd.f32 %v1914_v60, %v1750_v58  ;;  %v417_v8 = vmul.f32 %v3069_v27, %v3255_v62  ;;  %v418_v25 = vmul.f32 %v3069_v27, %v3260_v14 }
  0x8d   : > { %v419_v11 = vmul.f32 %v3069_v27, %v3262_v15  ;;  %v1995_v16 = vadd.f32 %v1916_v2, %v1751_v9  ;;  %v662_v17 = vmul.f32 %v3072_v28, %v3255_v62  ;;  %v663_v31 = vmul.f32 %v3072_v28, %v3260_v14 }
  0x8e   : > { %v664_v33 = vmul.f32 %v3072_v28, %v3262_v15  ;;  %v2033_v34 = vadd.f32 %v3191_v12, %v1994_v21  ;;  %v520_v0 = vrot.slane %v417_v8, 1  ;;  %v521_v4 = vrot.slane %v418_v25, 1 }
  0x8f   : > { %v523_v35 = vrot.slane %v419_v11, 1  ;;  %v2034_v13 = vadd.f32 %v3191_v12, %v1995_v16  ;;  %v765_v37 = vrot.slane %v662_v17, 2  ;;  %v766_v38 = vrot.slane %v663_v31, 2 }
  0x90   : > { %v768_v39 = vrot.slane %v664_v33, 2  ;;  %v2065_v42 = vmax.f32 %v2033_v34, 0.0  ;;  %v522_v43 = vsel %vm504_vm0, %v520_v0, %v521_v4  ;;  %v904_v14 = vmul.f32 %v3395_v32, %v3078_v30 }
  0x91   : > { %v524_v62 = vsel %vm504_vm0, %v521_v4, %v523_v35  ;;  %v2066_v44 = vmax.f32 %v2034_v13, 0.0  ;;  %v623_v15 = vadd.f32 %v522_v43, %v346_v55  ;;  %v767_v46 = vsel %vm749_vm1, %v765_v37, %v766_v38 }
  0x92   : > { %v624_v45 = vadd.f32 %v524_v62, %v347_v20  ;;  %v2097_v47 = vmin.f32 %v2065_v42, 6.0  ;;  %v769_v48 = vsel %vm749_vm1, %v766_v38, %v768_v39  ;;  %v905_v49 = vmul.f32 %v3400_v40, %v3078_v30 }
  0x93   : > { %v975_v50 = vmul.f32 %v3395_v32, %v3100_v52  ;;  %v2098_v51 = vmin.f32 %v2066_v44, 6.0  ;;  %v868_v56 = vadd.f32 %v767_v46, %v623_v15  ;;  %v976_v58 = vmul.f32 %v3400_v40, %v3100_v52 }
  0x94   : > { %v869_v57 = vadd.f32 %v769_v48, %v624_v45  ;;  %v977_v60 = vmul.f32 %v3100_v52, %v3402_v41  ;;  %v1219_v2 = vmul.f32 %v3395_v32, %v3103_v53  ;;  %v1220_v55 = vmul.f32 %v3400_v40, %v3103_v53  ;;  %v3601_v45 = vld [vmem:[%s4327_s1 + $0x8] ss:$0 sm:$0xff] }
  0x95   : > { %v1077_v9 = vrot.slane %v975_v50, 1  ;;  %v2119_v20 = vpack.c.bf16 %v2098_v51, %v2097_v47  ;;  %v936_v21 = vadd.f32 %v904_v14, %v868_v56  ;;  %v1078_v25 = vrot.slane %v976_v58, 1  ;;  %v265_v14 = vld [vmem:[%s3036_s6 + $0x9c] sm:$0xff]   ;;  %v267_v56 = vld [vmem:[%s3036_s6 + $0xa4] sm:$0x1] }
  0x96   : > { %v937_v8 = vadd.f32 %v905_v49, %v869_v57  ;;  %v1080_v11 = vrot.slane %v977_v60, 1  ;;  %v1221_v16 = vmul.f32 %v3103_v53, %v3402_v41  ;;  %v1321_v17 = vrot.slane %v1219_v2, 2 }
  0x97   : > { %v1322_v31 = vrot.slane %v1220_v55, 2  ;;  %2921 = vmatprep.mubr.bf16.mxu1 %v2119_v20  ;;  %v1079_v33 = vsel %vm504_vm0, %v1077_v9, %v1078_v25  ;;  %v1460_v34 = vmul.f32 %v3106_v54, %v3535_v23  ;;  %v1461_v0 = vmul.f32 %v3106_v54, %v3540_v61 }
  0x98   : > { %v1531_v4 = vmul.f32 %v3149_v36, %v3535_v23  ;;  %v1081_v35 = vsel %vm504_vm0, %v1078_v25, %v1080_v11  ;;  %v1180_v13 = vadd.f32 %v1079_v33, %v936_v21  ;;  %v1324_v38 = vrot.slane %v1221_v16, 2 }
  0x99   : > { %v1323_v37 = vsel %vm749_vm1, %v1321_v17, %v1322_v31  ;;  %v1181_v39 = vadd.f32 %v1081_v35, %v937_v8  ;;  %v1532_v42 = vmul.f32 %v3149_v36, %v3540_v61  ;;  %v1533_v43 = vmul.f32 %v3149_v36, %v3542_v63 }
  0x9a   : > { %v1633_v62 = vrot.slane %v1531_v4, 1  ;;  %v1325_v44 = vsel %vm749_vm1, %v1322_v31, %v1324_v38  ;;  %v1424_v15 = vadd.f32 %v1323_v37, %v1180_v13  ;;  %v1775_v46 = vmul.f32 %v3601_v45, %v3535_v23 }
  0x9b   : > { %v1776_v47 = vmul.f32 %v3601_v45, %v3540_v61  ;;  %v1425_v48 = vadd.f32 %v1325_v44, %v1181_v39  ;;  %v1634_v49 = vrot.slane %v1532_v42, 1  ;;  %v1636_v50 = vrot.slane %v1533_v43, 1 }
  0x9c   : > { %v1777_v51 = vmul.f32 %v3601_v45, %v3542_v63  ;;  %v1492_v57 = vadd.f32 %v1460_v34, %v1424_v15  ;;  %v1877_v58 = vrot.slane %v1775_v46, 2  ;;  %v3610_v9 = vunpack.c.l.bf16 %v265_v14  ;;  %v3640_v15 = vld [vmem:[%s4328_s2] ss:$0 sm:$0xff] }
  0x9d   : > { %v1878_v60 = vrot.slane %v1776_v47, 2  ;;  %v1493_v2 = vadd.f32 %v1461_v0, %v1425_v48  ;;  %v1635_v55 = vsel %vm504_vm0, %v1633_v62, %v1634_v49  ;;  %v1637_v20 = vsel %vm504_vm0, %v1634_v49, %v1636_v50 }
  0x9e   : > { %v1880_v21 = vrot.slane %v1777_v51, 2  ;;  %v1736_v8 = vadd.f32 %v1635_v55, %v1492_v57  ;;  %v3615_v11 = vunpack.c.h.bf16 %v265_v14  ;;  %v3617_v16 = vunpack.c.l.bf16 %v267_v56 }
  0x9f   : > { %v1879_v25 = vsel %vm749_vm1, %v1877_v58, %v1878_v60  ;;  %v1737_v17 = vadd.f32 %v1637_v20, %v1493_v2  ;;  %v362_v33 = vmul.f32 %v3066_v26, %v3325_v1  ;;  %v363_v34 = vmul.f32 %v3066_v26, %v3330_v18 }
  0xa0   : > { %v1881_v31 = vsel %vm749_vm1, %v1878_v60, %v1880_v21  ;;  %v1980_v0 = vadd.f32 %v1879_v25, %v1736_v8  ;;  %v441_v4 = vmul.f32 %v3069_v27, %v3325_v1  ;;  %v442_v35 = vmul.f32 %v3069_v27, %v3330_v18 }
  0xa1   : > { %v443_v13 = vmul.f32 %v3069_v27, %v3332_v29  ;;  %v1981_v37 = vadd.f32 %v1881_v31, %v1737_v17  ;;  %v686_v38 = vmul.f32 %v3072_v28, %v3325_v1  ;;  %v687_v39 = vmul.f32 %v3072_v28, %v3330_v18 }
  0xa2   : > { %v688_v42 = vmul.f32 %v3072_v28, %v3332_v29  ;;  %v2019_v43 = vadd.f32 %v3191_v12, %v1980_v0  ;;  %v560_v62 = vrot.slane %v441_v4, 1  ;;  %v561_v14 = vrot.slane %v442_v35, 1 }
  0xa3   : > { %v563_v44 = vrot.slane %v443_v13, 1  ;;  %v2020_v46 = vadd.f32 %v3640_v15, %v1981_v37  ;;  %v805_v47 = vrot.slane %v686_v38, 2  ;;  %v806_v1 = vrot.slane %v687_v39, 2 }
  0xa4   : > { %v808_v48 = vrot.slane %v688_v42, 2  ;;  %v2051_v49 = vmax.f32 %v2019_v43, 0.0  ;;  %v562_v18 = vsel %vm504_vm0, %v560_v62, %v561_v14  ;;  %v920_v12 = vmul.f32 %v3465_v24, %v3078_v30 }
  0xa5   : > { %v564_v29 = vsel %vm504_vm0, %v561_v14, %v563_v44  ;;  %v2052_v50 = vmax.f32 %v2020_v46, 0.0  ;;  %v639_v51 = vadd.f32 %v562_v18, %v362_v33  ;;  %v807_v57 = vsel %vm749_vm1, %v805_v47, %v806_v1 }
  0xa6   : > { %v640_v56 = vadd.f32 %v564_v29, %v363_v34  ;;  %v2083_v58 = vmin.f32 %v2051_v49, 6.0  ;;  %v809_v60 = vsel %vm749_vm1, %v806_v1, %v808_v48  ;;  %v921_v2 = vmul.f32 %v3470_v19, %v3078_v30 }
  0xa7   : > { %v999_v55 = vmul.f32 %v3465_v24, %v3100_v52  ;;  %v2084_v20 = vmin.f32 %v2052_v50, 6.0  ;;  %v884_v21 = vadd.f32 %v807_v57, %v639_v51  ;;  %v1000_v25 = vmul.f32 %v3470_v19, %v3100_v52  ;;  %v2840_v50 = vld [vmem:[%s3036_s6 + $0x48] sm:$0xff]  }
  0xa8   : > { %v885_v8 = vadd.f32 %v809_v60, %v640_v56  ;;  %v1001_v17 = vmul.f32 %v3100_v52, %v3472_v22  ;;  %v1243_v33 = vmul.f32 %v3465_v24, %v3103_v53  ;;  %v1244_v34 = vmul.f32 %v3470_v19, %v3103_v53 }
  0xa9   : > { %v1117_v31 = vrot.slane %v999_v55, 1  ;;  %v2112_v0 = vpack.c.bf16 %v2084_v20, %v2083_v58  ;;  %v952_v4 = vadd.f32 %v920_v12, %v884_v21  ;;  %v1118_v13 = vrot.slane %v1000_v25, 1  ;;  %v246_v21 = vld [vmem:[%s3036_s6 + $0x50] sm:$0x1] }
  0xaa   : > { %v953_v35 = vadd.f32 %v921_v2, %v885_v8  ;;  %v1120_v37 = vrot.slane %v1001_v17, 1  ;;  %v1245_v38 = vmul.f32 %v3103_v53, %v3472_v22  ;;  %v1361_v39 = vrot.slane %v1243_v33, 2 }
  0xab   : > { %v1362_v42 = vrot.slane %v1244_v34, 2  ;;  %2906 = vmatmul.mubr.bf16.gmra.mrb[4].mxu0 %v2112_v0  ;;  %v1119_v43 = vsel %vm504_vm0, %v1117_v31, %v1118_v13  ;;  %v1476_v62 = vmul.f32 %v3106_v54, %v3610_v9  ;;  %v1477_v14 = vmul.f32 %v3106_v54, %v3615_v11 }
  0xac   : > { %v1555_v44 = vmul.f32 %v3149_v36, %v3610_v9  ;;  %v1121_v46 = vsel %vm504_vm0, %v1118_v13, %v1120_v37  ;;  %v1196_v47 = vadd.f32 %v1119_v43, %v952_v4  ;;  %v1364_v48 = vrot.slane %v1245_v38, 2 }
  0xad   : > { %v1363_v1 = vsel %vm749_vm1, %v1361_v39, %v1362_v42  ;;  %v1197_v49 = vadd.f32 %v1121_v46, %v953_v35  ;;  %v1556_v18 = vmul.f32 %v3149_v36, %v3615_v11  ;;  %v1557_v29 = vmul.f32 %v3149_v36, %v3617_v16 }
  0xae   : > { %v1673_v12 = vrot.slane %v1555_v44, 1  ;;  %v1365_v51 = vsel %vm749_vm1, %v1362_v42, %v1364_v48  ;;  %v1440_v56 = vadd.f32 %v1363_v1, %v1196_v47  ;;  %v1799_v57 = vmul.f32 %v3601_v45, %v3610_v9 }
  0xaf   : > { %v1800_v58 = vmul.f32 %v3601_v45, %v3615_v11  ;;  %v1441_v60 = vadd.f32 %v1365_v51, %v1197_v49  ;;  %v1674_v2 = vrot.slane %v1556_v18, 1  ;;  %v1676_v55 = vrot.slane %v1557_v29, 1 }
  0xb0   : > { %v1801_v20 = vmul.f32 %v3601_v45, %v3617_v16  ;;  %v1508_v8 = vadd.f32 %v1476_v62, %v1440_v56  ;;  %v1917_v25 = vrot.slane %v1799_v57, 2  ;;  %v3685_v31 = vunpack.c.l.bf16 %v2840_v50 }
  0xb1   : > { %v1918_v17 = vrot.slane %v1800_v58, 2  ;;  %v1509_v33 = vadd.f32 %v1477_v14, %v1441_v60  ;;  %v1675_v34 = vsel %vm504_vm0, %v1673_v12, %v1674_v2  ;;  %v1677_v0 = vsel %vm504_vm0, %v1674_v2, %v1676_v55 }
  0xb2   : > { %v1920_v4 = vrot.slane %v1801_v20, 2  ;;  %v1752_v35 = vadd.f32 %v1675_v34, %v1508_v8  ;;  %v3690_v37 = vunpack.c.h.bf16 %v2840_v50  ;;  %v3692_v38 = vunpack.c.l.bf16 %v246_v21 }
  0xb3   : > { %v1919_v13 = vsel %vm749_vm1, %v1917_v25, %v1918_v17  ;;  %v1753_v39 = vadd.f32 %v1677_v0, %v1509_v33  ;;  %v348_v43 = vmul.f32 %v3395_v32, %v3066_v26  ;;  %v349_v62 = vmul.f32 %v3400_v40, %v3066_v26 }
  0xb4   : > { %v1921_v42 = vsel %vm749_vm1, %v1918_v17, %v1920_v4  ;;  %v1996_v14 = vadd.f32 %v1919_v13, %v1752_v35  ;;  %v420_v44 = vmul.f32 %v3395_v32, %v3069_v27  ;;  %v421_v46 = vmul.f32 %v3400_v40, %v3069_v27 }
  0xb5   : > { %v422_v47 = vmul.f32 %v3069_v27, %v3402_v41  ;;  %v1997_v1 = vadd.f32 %v1921_v42, %v1753_v39  ;;  %v665_v48 = vmul.f32 %v3395_v32, %v3072_v28  ;;  %v666_v49 = vmul.f32 %v3400_v40, %v3072_v28 }
  0xb6   : > { %v667_v18 = vmul.f32 %v3072_v28, %v3402_v41  ;;  %v2035_v29 = vadd.f32 %v3640_v15, %v1996_v14  ;;  %v525_v12 = vrot.slane %v420_v44, 1  ;;  %v526_v50 = vrot.slane %v421_v46, 1 }
  0xb7   : > { %v528_v51 = vrot.slane %v422_v47, 1  ;;  %v2036_v56 = vadd.f32 %v3640_v15, %v1997_v1  ;;  %v770_v57 = vrot.slane %v665_v48, 2  ;;  %v771_v58 = vrot.slane %v666_v49, 2 }
  0xb8   : > { %v773_v60 = vrot.slane %v667_v18, 2  ;;  %v2067_v2 = vmax.f32 %v2035_v29, 0.0  ;;  %v527_v55 = vsel %vm504_vm0, %v525_v12, %v526_v50  ;;  %v906_v40 = vmul.f32 %v3078_v30, %v3535_v23 }
  0xb9   : > { %v529_v32 = vsel %vm504_vm0, %v526_v50, %v528_v51  ;;  %v2068_v20 = vmax.f32 %v2036_v56, 0.0  ;;  %v625_v41 = vadd.f32 %v527_v55, %v348_v43  ;;  %v772_v8 = vsel %vm749_vm1, %v770_v57, %v771_v58 }
  0xba   : > { %v626_v21 = vadd.f32 %v529_v32, %v349_v62  ;;  %v2099_v25 = vmin.f32 %v2067_v2, 6.0  ;;  %v774_v17 = vsel %vm749_vm1, %v771_v58, %v773_v60  ;;  %v907_v33 = vmul.f32 %v3078_v30, %v3540_v61 }
  0xbb   : > { %v978_v34 = vmul.f32 %v3100_v52, %v3535_v23  ;;  %v2100_v0 = vmin.f32 %v2068_v20, 6.0  ;;  %v870_v4 = vadd.f32 %v772_v8, %v625_v41  ;;  %v979_v13 = vmul.f32 %v3100_v52, %v3540_v61  ;;  %v2844_v20 = vld [vmem:[%s3036_s6 + $0xa8] sm:$0xff]  }
  0xbc   : > { %v871_v35 = vadd.f32 %v774_v17, %v626_v21  ;;  %v980_v39 = vmul.f32 %v3100_v52, %v3542_v63  ;;  %v1222_v43 = vmul.f32 %v3103_v53, %v3535_v23  ;;  %v1223_v62 = vmul.f32 %v3103_v53, %v3540_v61 }
  0xbd   : > { %v1082_v42 = vrot.slane %v978_v34, 1  ;;  %v2120_v14 = vpack.c.bf16 %v2100_v0, %v2099_v25  ;;  %v938_v44 = vadd.f32 %v906_v40, %v870_v4  ;;  %v1083_v47 = vrot.slane %v979_v13, 1  ;;  %v270_v4 = vld [vmem:[%s3036_s6 + $0xb0] sm:$0x1] }
  0xbe   : > { %v939_v46 = vadd.f32 %v907_v33, %v871_v35  ;;  %v1085_v1 = vrot.slane %v980_v39, 1  ;;  %v1224_v48 = vmul.f32 %v3103_v53, %v3542_v63  ;;  %v1326_v49 = vrot.slane %v1222_v43, 2 }
  0xbf   : > { %v1327_v18 = vrot.slane %v1223_v62, 2  ;;  %2922 = vmatmul.mubr.bf16.gmra.mrb[4].mxu1 %v2120_v14  ;;  %v1084_v29 = vsel %vm504_vm0, %v1082_v42, %v1083_v47  ;;  %v1462_v12 = vmul.f32 %v3685_v31, %v3106_v54  ;;  %v1463_v50 = vmul.f32 %v3690_v37, %v3106_v54 }
  0xc0   : > { %v1534_v51 = vmul.f32 %v3685_v31, %v3149_v36  ;;  %v1086_v56 = vsel %vm504_vm0, %v1083_v47, %v1085_v1  ;;  %v1182_v57 = vadd.f32 %v1084_v29, %v938_v44  ;;  %v1329_v60 = vrot.slane %v1224_v48, 2 }
  0xc1   : > { %v1328_v58 = vsel %vm749_vm1, %v1326_v49, %v1327_v18  ;;  %v1183_v2 = vadd.f32 %v1086_v56, %v939_v46  ;;  %v1535_v55 = vmul.f32 %v3690_v37, %v3149_v36  ;;  %v1536_v32 = vmul.f32 %v3149_v36, %v3692_v38 }
  0xc2   : > { %v1638_v40 = vrot.slane %v1534_v51, 1  ;;  %v1330_v41 = vsel %vm749_vm1, %v1327_v18, %v1329_v60  ;;  %v1426_v21 = vadd.f32 %v1328_v58, %v1182_v57  ;;  %v1778_v8 = vmul.f32 %v3601_v45, %v3685_v31 }
  0xc3   : > { %v1779_v25 = vmul.f32 %v3601_v45, %v3690_v37  ;;  %v1427_v17 = vadd.f32 %v1330_v41, %v1183_v2  ;;  %v1639_v33 = vrot.slane %v1535_v55, 1  ;;  %v1641_v34 = vrot.slane %v1536_v32, 1 }
  0xc4   : > { %v1780_v0 = vmul.f32 %v3601_v45, %v3692_v38  ;;  %v1494_v35 = vadd.f32 %v1462_v12, %v1426_v21  ;;  %v1882_v13 = vrot.slane %v1778_v8, 2  ;;  %v3755_v42 = vunpack.c.l.bf16 %v2844_v20 }
  0xc5   : > { %v1883_v39 = vrot.slane %v1779_v25, 2  ;;  %v1495_v43 = vadd.f32 %v1463_v50, %v1427_v17  ;;  %v1640_v62 = vsel %vm504_vm0, %v1638_v40, %v1639_v33  ;;  %v1642_v14 = vsel %vm504_vm0, %v1639_v33, %v1641_v34 }
  0xc6   : > { %v1885_v44 = vrot.slane %v1780_v0, 2  ;;  %v1738_v46 = vadd.f32 %v1640_v62, %v1494_v35  ;;  %v3760_v1 = vunpack.c.h.bf16 %v2844_v20  ;;  %v3762_v48 = vunpack.c.l.bf16 %v270_v4 }
  0xc7   : > { %v1884_v47 = vsel %vm749_vm1, %v1882_v13, %v1883_v39  ;;  %v1739_v49 = vadd.f32 %v1642_v14, %v1495_v43  ;;  %v364_v29 = vmul.f32 %v3465_v24, %v3066_v26  ;;  %v365_v12 = vmul.f32 %v3470_v19, %v3066_v26 }
  0xc8   : > { %v1886_v18 = vsel %vm749_vm1, %v1883_v39, %v1885_v44  ;;  %v1982_v50 = vadd.f32 %v1884_v47, %v1738_v46  ;;  %v444_v51 = vmul.f32 %v3465_v24, %v3069_v27  ;;  %v445_v56 = vmul.f32 %v3470_v19, %v3069_v27 }
  0xc9   : > { %v446_v57 = vmul.f32 %v3069_v27, %v3472_v22  ;;  %v1983_v58 = vadd.f32 %v1886_v18, %v1739_v49  ;;  %v689_v60 = vmul.f32 %v3465_v24, %v3072_v28  ;;  %v690_v2 = vmul.f32 %v3470_v19, %v3072_v28 }
  0xca   : > { %v691_v55 = vmul.f32 %v3072_v28, %v3472_v22  ;;  %v2021_v32 = vadd.f32 %v3640_v15, %v1982_v50  ;;  %v565_v40 = vrot.slane %v444_v51, 1  ;;  %v566_v20 = vrot.slane %v445_v56, 1 }
  0xcb   : > { %v568_v41 = vrot.slane %v446_v57, 1  ;;  %v2022_v21 = vadd.f32 %v3640_v15, %v1983_v58  ;;  %v810_v8 = vrot.slane %v689_v60, 2  ;;  %v811_v25 = vrot.slane %v690_v2, 2 }
  0xcc   : > { %v813_v17 = vrot.slane %v691_v55, 2  ;;  %v2053_v33 = vmax.f32 %v2021_v32, 0.0  ;;  %v567_v34 = vsel %vm504_vm0, %v565_v40, %v566_v20  ;;  %v922_v19 = vmul.f32 %v3078_v30, %v3610_v9 }
  0xcd   : > { %v569_v24 = vsel %vm504_vm0, %v566_v20, %v568_v41  ;;  %v2054_v0 = vmax.f32 %v2022_v21, 0.0  ;;  %v641_v22 = vadd.f32 %v567_v34, %v364_v29  ;;  %v812_v35 = vsel %vm749_vm1, %v810_v8, %v811_v25 }
  0xce   : > { %v642_v4 = vadd.f32 %v569_v24, %v365_v12  ;;  %v2085_v13 = vmin.f32 %v2053_v33, 6.0  ;;  %v814_v39 = vsel %vm749_vm1, %v811_v25, %v813_v17  ;;  %v923_v43 = vmul.f32 %v3078_v30, %v3615_v11 }
  0xcf   : > { %v1002_v62 = vmul.f32 %v3100_v52, %v3610_v9  ;;  %v2086_v14 = vmin.f32 %v2054_v0, 6.0  ;;  %v886_v44 = vadd.f32 %v812_v35, %v641_v22  ;;  %v1003_v47 = vmul.f32 %v3100_v52, %v3615_v11  ;;  %v247_v0 = vld [vmem:[%s3036_s6 + $0x54] sm:$0xff]  }
  0xd0   : > { %v887_v46 = vadd.f32 %v814_v39, %v642_v4  ;;  %v1004_v49 = vmul.f32 %v3100_v52, %v3617_v16  ;;  %v1246_v29 = vmul.f32 %v3103_v53, %v3610_v9  ;;  %v1247_v12 = vmul.f32 %v3103_v53, %v3615_v11 }
  0xd1   : > { %v1122_v18 = vrot.slane %v1002_v62, 1  ;;  %v2113_v50 = vpack.c.bf16 %v2086_v14, %v2085_v13  ;;  %v954_v51 = vadd.f32 %v922_v19, %v886_v44  ;;  %v1123_v57 = vrot.slane %v1003_v47, 1  ;;  %v249_v44 = vld [vmem:[%s3036_s6 + $0x5c] sm:$0x1] }
  0xd2   : > { %v955_v56 = vadd.f32 %v923_v43, %v887_v46  ;;  %v1125_v58 = vrot.slane %v1004_v49, 1  ;;  %v1248_v60 = vmul.f32 %v3103_v53, %v3617_v16  ;;  %v1366_v2 = vrot.slane %v1246_v29, 2 }
  0xd3   : > { %v1367_v55 = vrot.slane %v1247_v12, 2  ;;  %2909 = vmatprep.mubr.bf16.mxu0 %v2113_v50  ;;  %v1124_v32 = vsel %vm504_vm0, %v1122_v18, %v1123_v57  ;;  %v1478_v40 = vmul.f32 %v3755_v42, %v3106_v54  ;;  %v1479_v20 = vmul.f32 %v3760_v1, %v3106_v54 }
  0xd4   : > { %v1558_v41 = vmul.f32 %v3755_v42, %v3149_v36  ;;  %v1126_v21 = vsel %vm504_vm0, %v1123_v57, %v1125_v58  ;;  %v1198_v8 = vadd.f32 %v1124_v32, %v954_v51  ;;  %v1369_v17 = vrot.slane %v1248_v60, 2 }
  0xd5   : > { %v1368_v25 = vsel %vm749_vm1, %v1366_v2, %v1367_v55  ;;  %v1199_v33 = vadd.f32 %v1126_v21, %v955_v56  ;;  %v1559_v34 = vmul.f32 %v3760_v1, %v3149_v36  ;;  %v1560_v24 = vmul.f32 %v3149_v36, %v3762_v48 }
  0xd6   : > { %v1678_v19 = vrot.slane %v1558_v41, 1  ;;  %v1370_v22 = vsel %vm749_vm1, %v1367_v55, %v1369_v17  ;;  %v1442_v4 = vadd.f32 %v1368_v25, %v1198_v8  ;;  %v1802_v35 = vmul.f32 %v3601_v45, %v3755_v42 }
  0xd7   : > { %v1803_v13 = vmul.f32 %v3601_v45, %v3760_v1  ;;  %v1443_v39 = vadd.f32 %v1370_v22, %v1199_v33  ;;  %v1679_v43 = vrot.slane %v1559_v34, 1  ;;  %v1681_v62 = vrot.slane %v1560_v24, 1 }
  0xd8   : > { %v1804_v14 = vmul.f32 %v3601_v45, %v3762_v48  ;;  %v1510_v46 = vadd.f32 %v1478_v40, %v1442_v4  ;;  %v1922_v47 = vrot.slane %v1802_v35, 2  ;;  %v3825_v18 = vunpack.c.l.bf16 %v247_v0 }
  0xd9   : > { %v1923_v49 = vrot.slane %v1803_v13, 2  ;;  %v1511_v29 = vadd.f32 %v1479_v20, %v1443_v39  ;;  %v1680_v12 = vsel %vm504_vm0, %v1678_v19, %v1679_v43  ;;  %v1682_v50 = vsel %vm504_vm0, %v1679_v43, %v1681_v62 }
  0xda   : > { %v1925_v51 = vrot.slane %v1804_v14, 2  ;;  %v1754_v56 = vadd.f32 %v1680_v12, %v1510_v46  ;;  %v3830_v58 = vunpack.c.h.bf16 %v247_v0  ;;  %v3832_v60 = vunpack.c.l.bf16 %v249_v44 }
  0xdb   : > { %v1924_v57 = vsel %vm749_vm1, %v1922_v47, %v1923_v49  ;;  %v1755_v2 = vadd.f32 %v1682_v50, %v1511_v29  ;;  %v350_v32 = vmul.f32 %v3066_v26, %v3535_v23  ;;  %v351_v40 = vmul.f32 %v3066_v26, %v3540_v61 }
  0xdc   : > { %v1926_v55 = vsel %vm749_vm1, %v1923_v49, %v1925_v51  ;;  %v1998_v20 = vadd.f32 %v1924_v57, %v1754_v56  ;;  %v423_v41 = vmul.f32 %v3069_v27, %v3535_v23  ;;  %v424_v21 = vmul.f32 %v3069_v27, %v3540_v61 }
  0xdd   : > { %v425_v8 = vmul.f32 %v3069_v27, %v3542_v63  ;;  %v1999_v25 = vadd.f32 %v1926_v55, %v1755_v2  ;;  %v668_v17 = vmul.f32 %v3072_v28, %v3535_v23  ;;  %v669_v33 = vmul.f32 %v3072_v28, %v3540_v61 }
  0xde   : > { %v670_v34 = vmul.f32 %v3072_v28, %v3542_v63  ;;  %v2037_v24 = vadd.f32 %v3640_v15, %v1998_v20  ;;  %v530_v19 = vrot.slane %v423_v41, 1  ;;  %v531_v0 = vrot.slane %v424_v21, 1 }
  0xdf   : > { %v533_v22 = vrot.slane %v425_v8, 1  ;;  %v2038_v4 = vadd.f32 %v3640_v15, %v1999_v25  ;;  %v775_v35 = vrot.slane %v668_v17, 2  ;;  %v776_v13 = vrot.slane %v669_v33, 2 }
  0xe0   : > { %v778_v39 = vrot.slane %v670_v34, 2  ;;  %v2069_v43 = vmax.f32 %v2037_v24, 0.0  ;;  %v532_v62 = vsel %vm504_vm0, %v530_v19, %v531_v0  ;;  %v908_v61 = vmul.f32 %v3685_v31, %v3078_v30 }
  0xe1   : > { %v534_v23 = vsel %vm504_vm0, %v531_v0, %v533_v22  ;;  %v2070_v14 = vmax.f32 %v2038_v4, 0.0  ;;  %v627_v63 = vadd.f32 %v532_v62, %v350_v32  ;;  %v777_v46 = vsel %vm749_vm1, %v775_v35, %v776_v13 }
  0xe2   : > { %v628_v44 = vadd.f32 %v534_v23, %v351_v40  ;;  %v2101_v47 = vmin.f32 %v2069_v43, 6.0  ;;  %v779_v49 = vsel %vm749_vm1, %v776_v13, %v778_v39  ;;  %v909_v29 = vmul.f32 %v3690_v37, %v3078_v30 }
  0xe3   : > { %v981_v12 = vmul.f32 %v3685_v31, %v3100_v52  ;;  %v2102_v50 = vmin.f32 %v2070_v14, 6.0  ;;  %v872_v51 = vadd.f32 %v777_v46, %v627_v63  ;;  %v982_v57 = vmul.f32 %v3690_v37, %v3100_v52  ;;  %v271_v14 = vld [vmem:[%s3036_s6 + $0xb4] sm:$0xff]  }
  0xe4   : > { %v873_v56 = vadd.f32 %v779_v49, %v628_v44  ;;  %v983_v2 = vmul.f32 %v3100_v52, %v3692_v38  ;;  %v1225_v32 = vmul.f32 %v3685_v31, %v3103_v53  ;;  %v1226_v40 = vmul.f32 %v3690_v37, %v3103_v53 }
  0xe5   : > { %v1087_v55 = vrot.slane %v981_v12, 1  ;;  %v2121_v20 = vpack.c.bf16 %v2102_v50, %v2101_v47  ;;  %v940_v41 = vadd.f32 %v908_v61, %v872_v51  ;;  %v1088_v8 = vrot.slane %v982_v57, 1  ;;  %v273_v51 = vld [vmem:[%s3036_s6 + $0xbc] sm:$0x1] }
  0xe6   : > { %v941_v21 = vadd.f32 %v909_v29, %v873_v56  ;;  %v1090_v25 = vrot.slane %v983_v2, 1  ;;  %v1227_v17 = vmul.f32 %v3103_v53, %v3692_v38  ;;  %v1331_v33 = vrot.slane %v1225_v32, 2 }
  0xe7   : > { %v1332_v34 = vrot.slane %v1226_v40, 2  ;;  %2925 = vmatprep.mubr.bf16.mxu1 %v2121_v20  ;;  %v1089_v24 = vsel %vm504_vm0, %v1087_v55, %v1088_v8  ;;  %v1464_v19 = vmul.f32 %v3106_v54, %v3825_v18  ;;  %v1465_v0 = vmul.f32 %v3106_v54, %v3830_v58 }
  0xe8   : > { %v1537_v22 = vmul.f32 %v3149_v36, %v3825_v18  ;;  %v1091_v4 = vsel %vm504_vm0, %v1088_v8, %v1090_v25  ;;  %v1184_v35 = vadd.f32 %v1089_v24, %v940_v41  ;;  %v1334_v39 = vrot.slane %v1227_v17, 2 }
  0xe9   : > { %v1333_v13 = vsel %vm749_vm1, %v1331_v33, %v1332_v34  ;;  %v1185_v43 = vadd.f32 %v1091_v4, %v941_v21  ;;  %v1538_v62 = vmul.f32 %v3149_v36, %v3830_v58  ;;  %v1539_v23 = vmul.f32 %v3149_v36, %v3832_v60 }
  0xea   : > { %v1643_v61 = vrot.slane %v1537_v22, 1  ;;  %v1335_v63 = vsel %vm749_vm1, %v1332_v34, %v1334_v39  ;;  %v1428_v44 = vadd.f32 %v1333_v13, %v1184_v35  ;;  %v1781_v46 = vmul.f32 %v3601_v45, %v3825_v18 }
  0xeb   : > { %v1782_v47 = vmul.f32 %v3601_v45, %v3830_v58  ;;  %v1429_v49 = vadd.f32 %v1335_v63, %v1185_v43  ;;  %v1644_v29 = vrot.slane %v1538_v62, 1  ;;  %v1646_v12 = vrot.slane %v1539_v23, 1 }
  0xec   : > { %v1783_v50 = vmul.f32 %v3601_v45, %v3832_v60  ;;  %v1496_v56 = vadd.f32 %v1464_v19, %v1428_v44  ;;  %v1887_v57 = vrot.slane %v1781_v46, 2  ;;  %v3895_v55 = vunpack.c.l.bf16 %v271_v14 }
  0xed   : > { %v1888_v2 = vrot.slane %v1782_v47, 2  ;;  %v1497_v32 = vadd.f32 %v1465_v0, %v1429_v49  ;;  %v1645_v40 = vsel %vm504_vm0, %v1643_v61, %v1644_v29  ;;  %v1647_v20 = vsel %vm504_vm0, %v1644_v29, %v1646_v12 }
  0xee   : > { %v1890_v41 = vrot.slane %v1783_v50, 2  ;;  %v1740_v21 = vadd.f32 %v1645_v40, %v1496_v56  ;;  %v3900_v25 = vunpack.c.h.bf16 %v271_v14  ;;  %v3902_v17 = vunpack.c.l.bf16 %v273_v51 }
  0xef   : > { %v1889_v8 = vsel %vm749_vm1, %v1887_v57, %v1888_v2  ;;  %v1741_v33 = vadd.f32 %v1647_v20, %v1497_v32  ;;  %v366_v24 = vmul.f32 %v3066_v26, %v3610_v9  ;;  %v367_v19 = vmul.f32 %v3066_v26, %v3615_v11 }
  0xf0   : > { %v1891_v34 = vsel %vm749_vm1, %v1888_v2, %v1890_v41  ;;  %v1984_v0 = vadd.f32 %v1889_v8, %v1740_v21  ;;  %v447_v22 = vmul.f32 %v3069_v27, %v3610_v9  ;;  %v448_v4 = vmul.f32 %v3069_v27, %v3615_v11 }
  0xf1   : > { %v449_v35 = vmul.f32 %v3069_v27, %v3617_v16  ;;  %v1985_v13 = vadd.f32 %v1891_v34, %v1741_v33  ;;  %v692_v39 = vmul.f32 %v3072_v28, %v3610_v9  ;;  %v693_v43 = vmul.f32 %v3072_v28, %v3615_v11 }
  0xf2   : > { %v694_v62 = vmul.f32 %v3072_v28, %v3617_v16  ;;  %v2023_v23 = vadd.f32 %v3640_v15, %v1984_v0  ;;  %v570_v61 = vrot.slane %v447_v22, 1  ;;  %v571_v14 = vrot.slane %v448_v4, 1 }
  0xf3   : > { %v573_v63 = vrot.slane %v449_v35, 1  ;;  %v2024_v44 = vadd.f32 %v3640_v15, %v1985_v13  ;;  %v815_v46 = vrot.slane %v692_v39, 2  ;;  %v816_v47 = vrot.slane %v693_v43, 2 }
  0xf4   : > { %v818_v49 = vrot.slane %v694_v62, 2  ;;  %v2055_v29 = vmax.f32 %v2023_v23, 0.0  ;;  %v572_v12 = vsel %vm504_vm0, %v570_v61, %v571_v14  ;;  %v924_v11 = vmul.f32 %v3755_v42, %v3078_v30 }
  0xf5   : > { %v574_v9 = vsel %vm504_vm0, %v571_v14, %v573_v63  ;;  %v2056_v50 = vmax.f32 %v2024_v44, 0.0  ;;  %v643_v16 = vadd.f32 %v572_v12, %v366_v24  ;;  %v817_v56 = vsel %vm749_vm1, %v815_v46, %v816_v47 }
  0xf6   : > { %v644_v51 = vadd.f32 %v574_v9, %v367_v19  ;;  %v2087_v57 = vmin.f32 %v2055_v29, 6.0  ;;  %v819_v2 = vsel %vm749_vm1, %v816_v47, %v818_v49  ;;  %v925_v32 = vmul.f32 %v3760_v1, %v3078_v30 }
  0xf7   : > { %v1005_v40 = vmul.f32 %v3755_v42, %v3100_v52  ;;  %v2088_v20 = vmin.f32 %v2056_v50, 6.0  ;;  %v888_v41 = vadd.f32 %v817_v56, %v643_v16  ;;  %v1006_v8 = vmul.f32 %v3760_v1, %v3100_v52 }
  0xf8   : > { %v889_v21 = vadd.f32 %v819_v2, %v644_v51  ;;  %v1007_v33 = vmul.f32 %v3100_v52, %v3762_v48  ;;  %v1249_v24 = vmul.f32 %v3755_v42, %v3103_v53  ;;  %v1250_v19 = vmul.f32 %v3760_v1, %v3103_v53 }
  0xf9   : > { %v1127_v34 = vrot.slane %v1005_v40, 1  ;;  %v2114_v0 = vpack.c.bf16 %v2088_v20, %v2087_v57  ;;  %v956_v22 = vadd.f32 %v924_v11, %v888_v41  ;;  %v1128_v35 = vrot.slane %v1006_v8, 1 }
  0xfa   : > { %v957_v4 = vadd.f32 %v925_v32, %v889_v21  ;;  %v1130_v13 = vrot.slane %v1007_v33, 1  ;;  %v1251_v39 = vmul.f32 %v3103_v53, %v3762_v48  ;;  %v1371_v43 = vrot.slane %v1249_v24, 2 }
  0xfb   : > { %v1372_v62 = vrot.slane %v1250_v19, 2  ;;  %2910 = vmatmul.mubr.bf16.gmra.mrb[8].mxu0 %v2114_v0  ;;  %v1129_v23 = vsel %vm504_vm0, %v1127_v34, %v1128_v35  ;;  %v1480_v61 = vmul.f32 %v3106_v54, %v3895_v55  ;;  %v1481_v14 = vmul.f32 %v3106_v54, %v3900_v25 }
  0xfc   : > { %v1561_v63 = vmul.f32 %v3149_v36, %v3895_v55  ;;  %v1131_v44 = vsel %vm504_vm0, %v1128_v35, %v1130_v13  ;;  %v1200_v46 = vadd.f32 %v1129_v23, %v956_v22  ;;  %v1374_v49 = vrot.slane %v1251_v39, 2 }
  0xfd   : > { %v1373_v47 = vsel %vm749_vm1, %v1371_v43, %v1372_v62  ;;  %v1201_v29 = vadd.f32 %v1131_v44, %v957_v4  ;;  %v1562_v12 = vmul.f32 %v3149_v36, %v3900_v25  ;;  %v1563_v9 = vmul.f32 %v3149_v36, %v3902_v17 }
  0xfe   : > { %v1683_v11 = vrot.slane %v1561_v63, 1  ;;  %v1375_v50 = vsel %vm749_vm1, %v1372_v62, %v1374_v49  ;;  %v1444_v16 = vadd.f32 %v1373_v47, %v1200_v46  ;;  %v1805_v51 = vmul.f32 %v3601_v45, %v3895_v55 }
  0xff   : > { %v1806_v56 = vmul.f32 %v3601_v45, %v3900_v25  ;;  %v1445_v57 = vadd.f32 %v1375_v50, %v1201_v29  ;;  %v1684_v2 = vrot.slane %v1562_v12, 1  ;;  %v1686_v32 = vrot.slane %v1563_v9, 1 }
 0x100   : > { %v1807_v40 = vmul.f32 %v3601_v45, %v3902_v17  ;;  %v1512_v20 = vadd.f32 %v1480_v61, %v1444_v16  ;;  %v1927_v41 = vrot.slane %v1805_v51, 2  ;;  %v352_v8 = vmul.f32 %v3685_v31, %v3066_v26 }
 0x101   : > { %v1928_v21 = vrot.slane %v1806_v56, 2  ;;  %v1513_v33 = vadd.f32 %v1481_v14, %v1445_v57  ;;  %v1685_v34 = vsel %vm504_vm0, %v1683_v11, %v1684_v2  ;;  %v1687_v24 = vsel %vm504_vm0, %v1684_v2, %v1686_v32 }
 0x102   : > { %v1930_v19 = vrot.slane %v1807_v40, 2  ;;  %v1756_v0 = vadd.f32 %v1685_v34, %v1512_v20  ;;  %v353_v4 = vmul.f32 %v3690_v37, %v3066_v26  ;;  %v426_v35 = vmul.f32 %v3685_v31, %v3069_v27 }
 0x103   : > { %v1929_v22 = vsel %vm749_vm1, %v1927_v41, %v1928_v21  ;;  %v1757_v13 = vadd.f32 %v1687_v24, %v1513_v33  ;;  %v427_v43 = vmul.f32 %v3690_v37, %v3069_v27  ;;  %v428_v62 = vmul.f32 %v3069_v27, %v3692_v38 }
 0x104   : > { %v1931_v39 = vsel %vm749_vm1, %v1928_v21, %v1930_v19  ;;  %v2000_v23 = vadd.f32 %v1929_v22, %v1756_v0  ;;  %v535_v61 = vrot.slane %v426_v35, 1  ;;  %v671_v14 = vmul.f32 %v3685_v31, %v3072_v28 }
 0x105   : > { %v672_v63 = vmul.f32 %v3690_v37, %v3072_v28  ;;  %v2001_v44 = vadd.f32 %v1931_v39, %v1757_v13  ;;  %v536_v46 = vrot.slane %v427_v43, 1  ;;  %v538_v47 = vrot.slane %v428_v62, 1 }
 0x106   : > { %v673_v49 = vmul.f32 %v3072_v28, %v3692_v38  ;;  %v2039_v29 = vadd.f32 %v3640_v15, %v2000_v23  ;;  %v780_v12 = vrot.slane %v671_v14, 2  ;;  %v910_v11 = vmul.f32 %v3078_v30, %v3825_v18 }
 0x107   : > { %v781_v9 = vrot.slane %v672_v63, 2  ;;  %v2040_v50 = vadd.f32 %v3640_v15, %v2001_v44  ;;  %v537_v31 = vsel %vm504_vm0, %v535_v61, %v536_v46  ;;  %v539_v16 = vsel %vm504_vm0, %v536_v46, %v538_v47 }
 0x108   : > { %v783_v37 = vrot.slane %v673_v49, 2  ;;  %v2071_v51 = vmax.f32 %v2039_v29, 0.0  ;;  %v629_v56 = vadd.f32 %v537_v31, %v352_v8  ;;  %v630_v57 = vadd.f32 %v539_v16, %v353_v4  ;;  %v2845_v31 = vld [vmem:[%s3036_s6 + $0xc0] sm:$0xff]  }
 0x109   : > { %v782_v2 = vsel %vm749_vm1, %v780_v12, %v781_v9  ;;  %v2072_v38 = vmax.f32 %v2040_v50, 0.0  ;;  %v911_v40 = vmul.f32 %v3078_v30, %v3830_v58  ;;  %v984_v20 = vmul.f32 %v3100_v52, %v3825_v18 }
 0x10a   : > { %v784_v32 = vsel %vm749_vm1, %v781_v9, %v783_v37  ;;  %v2103_v41 = vmin.f32 %v2071_v51, 6.0  ;;  %v874_v21 = vadd.f32 %v782_v2, %v629_v56  ;;  %v985_v34 = vmul.f32 %v3100_v52, %v3830_v58 }
 0x10b   : > { %v875_v33 = vadd.f32 %v784_v32, %v630_v57  ;;  %v2104_v24 = vmin.f32 %v2072_v38, 6.0  ;;  %v986_v8 = vmul.f32 %v3100_v52, %v3832_v60  ;;  %v1092_v19 = vrot.slane %v984_v20, 1 }
 0x10c   : > { %v1228_v0 = vmul.f32 %v3103_v53, %v3825_v18  ;;  %v942_v22 = vadd.f32 %v910_v11, %v874_v21  ;;  %v1093_v35 = vrot.slane %v985_v34, 1  ;;  %v1229_v13 = vmul.f32 %v3103_v53, %v3830_v58 }
 0x10d   : > { %v943_v4 = vadd.f32 %v911_v40, %v875_v33  ;;  %v2122_v39 = vpack.c.bf16 %v2104_v24, %v2103_v41  ;;  %v1095_v43 = vrot.slane %v986_v8, 1  ;;  %v1230_v62 = vmul.f32 %v3103_v53, %v3832_v60  ;;  %v276_v40 = vld [vmem:[%s3036_s6 + $0xc8] sm:$0x1] }
 0x10e   : > { %v1336_v23 = vrot.slane %v1228_v0, 2  ;;  %v1094_v61 = vsel %vm504_vm0, %v1092_v19, %v1093_v35  ;;  %v1337_v14 = vrot.slane %v1229_v13, 2  ;;  %v1466_v63 = vmul.f32 %v3127_v5, %v3106_v54 }
 0x10f   : > { %v1467_v44 = vmul.f32 %v3168_v59, %v3106_v54  ;;  %2926 = vmatmul.mubr.bf16.gmra.mrb[8].mxu1 %v2122_v39  ;;  %v1096_v46 = vsel %vm504_vm0, %v1093_v35, %v1095_v43  ;;  %v1186_v47 = vadd.f32 %v1094_v61, %v942_v22  ;;  %v1339_v49 = vrot.slane %v1230_v62, 2 }
 0x110   : > { %v1540_v29 = vmul.f32 %v3127_v5, %v3149_v36  ;;  %v1187_v12 = vadd.f32 %v1096_v46, %v943_v4  ;;  %v1338_v9 = vsel %vm749_vm1, %v1336_v23, %v1337_v14  ;;  %v1541_v11 = vmul.f32 %v3168_v59, %v3149_v36 }
 0x111   : > { %v1542_v50 = vmul.f32 %v3149_v36, %v3179_v6  ;;  %v1340_v16 = vsel %vm749_vm1, %v1337_v14, %v1339_v49  ;;  %v1430_v37 = vadd.f32 %v1338_v9, %v1186_v47  ;;  %v1784_v56 = vmul.f32 %v3601_v45, %v3127_v5 }
 0x112   : > { %v1648_v51 = vrot.slane %v1540_v29, 1  ;;  %v1431_v57 = vadd.f32 %v1340_v16, %v1187_v12  ;;  %v1649_v2 = vrot.slane %v1541_v11, 1  ;;  %v1785_v32 = vmul.f32 %v3601_v45, %v3168_v59 }
 0x113   : > { %v1651_v38 = vrot.slane %v1542_v50, 1  ;;  %v1498_v20 = vadd.f32 %v1466_v63, %v1430_v37  ;;  %v1786_v41 = vmul.f32 %v3601_v45, %v3179_v6  ;;  %v1892_v21 = vrot.slane %v1784_v56, 2 }
 0x114   : > { %v4027_v33 = vunpack.c.l.bf16 %v2845_v31  ;;  %v1499_v34 = vadd.f32 %v1467_v44, %v1431_v57  ;;  %v1650_v24 = vsel %vm504_vm0, %v1648_v51, %v1649_v2  ;;  %v1893_v19 = vrot.slane %v1785_v32, 2 }
 0x115   : > { %v1652_v8 = vsel %vm504_vm0, %v1649_v2, %v1651_v38  ;;  %v1742_v0 = vadd.f32 %v1650_v24, %v1498_v20  ;;  %v1895_v22 = vrot.slane %v1786_v41, 2  ;;  %v4031_v4 = vunpack.c.h.bf16 %v2845_v31 }
 0x116   : > { %v4033_v35 = vunpack.c.l.bf16 %v276_v40  ;;  %v1743_v13 = vadd.f32 %v1652_v8, %v1499_v34  ;;  %v1894_v39 = vsel %vm749_vm1, %v1892_v21, %v1893_v19  ;;  %v368_v45 = vmul.f32 %v3755_v42, %v3066_v26 }
 0x117   : > { %v369_v43 = vmul.f32 %v3760_v1, %v3066_v26  ;;  %v1896_v62 = vsel %vm749_vm1, %v1893_v19, %v1895_v22  ;;  %v1986_v23 = vadd.f32 %v1894_v39, %v1742_v0  ;;  %v450_v61 = vmul.f32 %v3755_v42, %v3069_v27 }
 0x118   : > { %v451_v14 = vmul.f32 %v3760_v1, %v3069_v27  ;;  %v1987_v63 = vadd.f32 %v1896_v62, %v1743_v13  ;;  %v452_v44 = vmul.f32 %v3069_v27, %v3762_v48  ;;  %v695_v46 = vmul.f32 %v3755_v42, %v3072_v28 }
 0x119   : > { %v696_v47 = vmul.f32 %v3760_v1, %v3072_v28  ;;  %v2025_v49 = vadd.f32 %v3640_v15, %v1986_v23  ;;  %v575_v29 = vrot.slane %v450_v61, 1  ;;  %v697_v9 = vmul.f32 %v3072_v28, %v3762_v48 }
 0x11a   : > { %v576_v12 = vrot.slane %v451_v14, 1  ;;  %v2026_v11 = vadd.f32 %v3640_v15, %v1987_v63  ;;  %v578_v50 = vrot.slane %v452_v44, 1  ;;  %v820_v31 = vrot.slane %v695_v46, 2 }
 0x11b   : > { %v821_v16 = vrot.slane %v696_v47, 2  ;;  %v2057_v37 = vmax.f32 %v2025_v49, 0.0  ;;  %v823_v56 = vrot.slane %v697_v9, 2  ;;  %v926_v42 = vmul.f32 %v3078_v30, %v3895_v55 }
 0x11c   : > { %v577_v51 = vsel %vm504_vm0, %v575_v29, %v576_v12  ;;  %v2058_v1 = vmax.f32 %v2026_v11, 0.0  ;;  %v579_v57 = vsel %vm504_vm0, %v576_v12, %v578_v50  ;;  %v927_v40 = vmul.f32 %v3078_v30, %v3900_v25 }
 0x11d   : > { %v645_v2 = vadd.f32 %v577_v51, %v368_v45  ;;  %v822_v38 = vsel %vm749_vm1, %v820_v31, %v821_v16  ;;  %v2089_v32 = vmin.f32 %v2057_v37, 6.0  ;;  %v646_v48 = vadd.f32 %v579_v57, %v369_v43 }
 0x11e   : > { %v824_v15 = vsel %vm749_vm1, %v821_v16, %v823_v56  ;;  %v2090_v20 = vmin.f32 %v2058_v1, 6.0  ;;  %v1008_v21 = vmul.f32 %v3100_v52, %v3895_v55  ;;  %v1009_v34 = vmul.f32 %v3100_v52, %v3900_v25  ;;  %v4092_v56 = vld [vmem:[%s4327_s1 + $0x8] ss:$0 sm:$0xff] }
 0x11f   : > { %v890_v41 = vadd.f32 %v822_v38, %v645_v2  ;;  %v891_v24 = vadd.f32 %v824_v15, %v646_v48  ;;  %v1010_v8 = vmul.f32 %v3100_v52, %v3902_v17  ;;  %v1252_v19 = vmul.f32 %v3103_v53, %v3895_v55 }
 0x120   : > { %v1253_v0 = vmul.f32 %v3103_v53, %v3900_v25  ;;  %v2115_v22 = vpack.c.bf16 %v2090_v20, %v2089_v32  ;;  %v1132_v39 = vrot.slane %v1008_v21, 1  ;;  %v1133_v45 = vrot.slane %v1009_v34, 1 }
 0x121   : > { %v958_v13 = vadd.f32 %v926_v42, %v890_v41  ;;  %v959_v43 = vadd.f32 %v927_v40, %v891_v24  ;;  %v1135_v62 = vrot.slane %v1010_v8, 1  ;;  %v1254_v23 = vmul.f32 %v3103_v53, %v3902_v17 }
 0x122   : > { %v1376_v61 = vrot.slane %v1252_v19, 2  ;;  %2913 = vmatprep.mubr.bf16.mxu0 %v2115_v22  ;;  %v1134_v14 = vsel %vm504_vm0, %v1132_v39, %v1133_v45  ;;  %v1377_v63 = vrot.slane %v1253_v0, 2  ;;  %v1482_v44 = vmul.f32 %v4027_v33, %v3106_v54 }
 0x123   : > { %v1483_v46 = vmul.f32 %v4031_v4, %v3106_v54  ;;  %v1136_v47 = vsel %vm504_vm0, %v1133_v45, %v1135_v62  ;;  %v1202_v49 = vadd.f32 %v1134_v14, %v958_v13  ;;  %v1379_v29 = vrot.slane %v1254_v23, 2 }
 0x124   : > { %v1564_v12 = vmul.f32 %v4027_v33, %v3149_v36  ;;  %v1203_v9 = vadd.f32 %v1136_v47, %v959_v43  ;;  %v1378_v11 = vsel %vm749_vm1, %v1376_v61, %v1377_v63  ;;  %v1565_v50 = vmul.f32 %v4031_v4, %v3149_v36  ;;  %v4121_v47 = vld [vmem:[%s4328_s2] ss:$0 sm:$0xff] }
 0x125   : > { %v1566_v31 = vmul.f32 %v3149_v36, %v4033_v35  ;;  %v1380_v16 = vsel %vm749_vm1, %v1377_v63, %v1379_v29  ;;  %v1446_v37 = vadd.f32 %v1378_v11, %v1202_v49  ;;  %v1808_v42 = vmul.f32 %v4092_v56, %v4027_v33 }
 0x126   : > { %v1688_v51 = vrot.slane %v1564_v12, 1  ;;  %v1447_v1 = vadd.f32 %v1380_v16, %v1203_v9  ;;  %v1689_v57 = vrot.slane %v1565_v50, 1  ;;  %v1809_v38 = vmul.f32 %v4092_v56, %v4031_v4 }
 0x127   : > { %v1691_v2 = vrot.slane %v1566_v31, 1  ;;  %v1514_v32 = vadd.f32 %v1482_v44, %v1446_v37  ;;  %v1810_v48 = vmul.f32 %v4092_v56, %v4033_v35  ;;  %v1932_v15 = vrot.slane %v1808_v42, 2 }
 0x128   : > { %v354_v40 = vmul.f32 %v3066_v26, %v3825_v18  ;;  %v1515_v20 = vadd.f32 %v1483_v46, %v1447_v1  ;;  %v1690_v41 = vsel %vm504_vm0, %v1688_v51, %v1689_v57  ;;  %v1933_v34 = vrot.slane %v1809_v38, 2 }
 0x129   : > { %v1692_v21 = vsel %vm504_vm0, %v1689_v57, %v1691_v2  ;;  %v1758_v24 = vadd.f32 %v1690_v41, %v1514_v32  ;;  %v1935_v8 = vrot.slane %v1810_v48, 2  ;;  %v355_v19 = vmul.f32 %v3066_v26, %v3830_v58 }
 0x12a   : > { %v429_v0 = vmul.f32 %v3069_v27, %v3825_v18  ;;  %v1759_v22 = vadd.f32 %v1692_v21, %v1515_v20  ;;  %v1934_v13 = vsel %vm749_vm1, %v1932_v15, %v1933_v34  ;;  %v430_v39 = vmul.f32 %v3069_v27, %v3830_v58 }
 0x12b   : > { %v431_v45 = vmul.f32 %v3069_v27, %v3832_v60  ;;  %v1936_v43 = vsel %vm749_vm1, %v1933_v34, %v1935_v8  ;;  %v2002_v62 = vadd.f32 %v1934_v13, %v1758_v24  ;;  %v674_v61 = vmul.f32 %v3072_v28, %v3825_v18 }
 0x12c   : > { %v540_v23 = vrot.slane %v429_v0, 1  ;;  %v2003_v14 = vadd.f32 %v1936_v43, %v1759_v22  ;;  %v541_v63 = vrot.slane %v430_v39, 1  ;;  %v675_v46 = vmul.f32 %v3072_v28, %v3830_v58 }
 0x12d   : > { %v543_v44 = vrot.slane %v431_v45, 1  ;;  %v2041_v49 = vadd.f32 %v4121_v47, %v2002_v62  ;;  %v676_v29 = vmul.f32 %v3072_v28, %v3832_v60  ;;  %v785_v12 = vrot.slane %v674_v61, 2 }
 0x12e   : > { %v912_v18 = vmul.f32 %v3127_v5, %v3078_v30  ;;  %v2042_v9 = vadd.f32 %v4121_v47, %v2003_v14  ;;  %v542_v11 = vsel %vm504_vm0, %v540_v23, %v541_v63  ;;  %v786_v50 = vrot.slane %v675_v46, 2  ;;  %v4131_v31 = vpop.f32.mrb[0].mxu0 }
 0x12f   : > { %v544_v58 = vsel %vm504_vm0, %v541_v63, %v543_v44  ;;  %v2073_v16 = vmax.f32 %v2041_v49, 0.0  ;;  %v631_v37 = vadd.f32 %v542_v11, %v354_v40  ;;  %v788_v42 = vrot.slane %v676_v29, 2  ;;  %v4133_v1 = vpop.f32.mrb[1].mxu0 }
 0x130   : > { %v632_v51 = vadd.f32 %v544_v58, %v355_v19  ;;  %v2074_v60 = vmax.f32 %v2042_v9, 0.0  ;;  %v787_v57 = vsel %vm749_vm1, %v785_v12, %v786_v50  ;;  %v913_v2 = vmul.f32 %v3168_v59, %v3078_v30  ;;  %v4140_v32 = vpop.f32.mrb[2].mxu0 }
 0x131   : > { %v987_v38 = vmul.f32 %v3127_v5, %v3100_v52  ;;  %v2105_v48 = vmin.f32 %v2073_v16, 6.0  ;;  %v789_v15 = vsel %vm749_vm1, %v786_v50, %v788_v42  ;;  %v876_v20 = vadd.f32 %v787_v57, %v631_v37  ;;  %v4145_v41 = vpop.f32.mrb[3].mxu0  ;;  %v277_v50 = vld [vmem:[%s3036_s6 + $0xcc] sm:$0xff]  }
 0x132   : > { %v988_v40 = vmul.f32 %v3168_v59, %v3100_v52  ;;  %v2106_v21 = vmin.f32 %v2074_v60, 6.0  ;;  %v877_v34 = vadd.f32 %v789_v15, %v632_v51  ;;  %v989_v24 = vmul.f32 %v3100_v52, %v3179_v6 }
 0x133   : > { %v1097_v8 = vrot.slane %v987_v38, 1  ;;  %v944_v19 = vadd.f32 %v912_v18, %v876_v20  ;;  %v1231_v22 = vmul.f32 %v3127_v5, %v3103_v53  ;;  %v1232_v13 = vmul.f32 %v3168_v59, %v3103_v53 }
 0x134   : > { %v1098_v0 = vrot.slane %v988_v40, 1  ;;  %v2123_v39 = vpack.c.bf16 %v2106_v21, %v2105_v48  ;;  %v945_v45 = vadd.f32 %v913_v2, %v877_v34  ;;  %v1100_v43 = vrot.slane %v989_v24, 1  ;;  %v4177_v48 = vld [vmem:[%s3036_s6 + $0xd4] sm:$0x1] }
 0x135   : > { %v1233_v62 = vmul.f32 %v3103_v53, %v3179_v6  ;;  %v1341_v61 = vrot.slane %v1231_v22, 2  ;;  %v1342_v14 = vrot.slane %v1232_v13, 2  ;;  %v1468_v63 = vmul.f32 %v3106_v54, %v3181_v7 }
 0x136   : > { %v1099_v23 = vsel %vm504_vm0, %v1097_v8, %v1098_v0  ;;  %2929 = vmatprep.mubr.bf16.mxu1 %v2123_v39  ;;  %v1101_v5 = vsel %vm504_vm0, %v1098_v0, %v1100_v43  ;;  %v1469_v59 = vmul.f32 %v3106_v54, %v3184_v3  ;;  %v1543_v6 = vmul.f32 %v3149_v36, %v3181_v7 }
 0x137   : > { %v1188_v44 = vadd.f32 %v1099_v23, %v944_v19  ;;  %v1344_v46 = vrot.slane %v1233_v62, 2  ;;  %v1189_v49 = vadd.f32 %v1101_v5, %v945_v45  ;;  %v1343_v29 = vsel %vm749_vm1, %v1341_v61, %v1342_v14 }
 0x138   : > { %v1544_v12 = vmul.f32 %v3149_v36, %v3184_v3  ;;  %v1545_v11 = vmul.f32 %v3149_v36, %v3186_v10  ;;  %v1787_v58 = vmul.f32 %v4092_v56, %v3181_v7  ;;  %v1653_v37 = vrot.slane %v1543_v6, 1 }
 0x139   : > { %v1345_v18 = vsel %vm749_vm1, %v1342_v14, %v1344_v46  ;;  %v1432_v9 = vadd.f32 %v1343_v29, %v1188_v44  ;;  %v1788_v42 = vmul.f32 %v4092_v56, %v3184_v3  ;;  %v1789_v2 = vmul.f32 %v4092_v56, %v3186_v10 }
 0x13a   : > { %v1433_v16 = vadd.f32 %v1345_v18, %v1189_v49  ;;  %v1654_v51 = vrot.slane %v1544_v12, 1  ;;  %v1656_v57 = vrot.slane %v1545_v11, 1  ;;  %v1897_v38 = vrot.slane %v1787_v58, 2 }
 0x13b   : > { %v1500_v60 = vadd.f32 %v1468_v63, %v1432_v9  ;;  %v1898_v40 = vrot.slane %v1788_v42, 2  ;;  %v4180_v7 = vunpack.c.l.bf16 %v277_v50  ;;  %v1900_v24 = vrot.slane %v1789_v2, 2 }
 0x13c   : > { %v1501_v15 = vadd.f32 %v1469_v59, %v1433_v16  ;;  %v1655_v20 = vsel %vm504_vm0, %v1653_v37, %v1654_v51  ;;  %v1657_v21 = vsel %vm504_vm0, %v1654_v51, %v1656_v57  ;;  %v4183_v8 = vunpack.c.h.bf16 %v277_v50 }
 0x13d   : > { %v1744_v34 = vadd.f32 %v1655_v20, %v1500_v60  ;;  %v1899_v19 = vsel %vm749_vm1, %v1897_v38, %v1898_v40  ;;  %v333_v10 = vunpack.c.l.bf16 %v4177_v48  ;;  %v370_v0 = vmul.f32 %v3066_v26, %v3895_v55 }
 0x13e   : > { %v1745_v3 = vadd.f32 %v1657_v21, %v1501_v15  ;;  %v1901_v22 = vsel %vm749_vm1, %v1898_v40, %v1900_v24  ;;  %v371_v39 = vmul.f32 %v3066_v26, %v3900_v25  ;;  %v453_v45 = vmul.f32 %v3069_v27, %v3895_v55 }
 0x13f   : > { %v1988_v13 = vadd.f32 %v1899_v19, %v1744_v34  ;;  %v454_v62 = vmul.f32 %v3069_v27, %v3900_v25  ;;  %v455_v23 = vmul.f32 %v3069_v27, %v3902_v17  ;;  %v698_v61 = vmul.f32 %v3072_v28, %v3895_v55 }
 0x140   : > { %v1989_v43 = vadd.f32 %v1901_v22, %v1745_v3  ;;  %v580_v63 = vrot.slane %v453_v45, 1  ;;  %v699_v5 = vmul.f32 %v3072_v28, %v3900_v25  ;;  %v700_v26 = vmul.f32 %v3072_v28, %v3902_v17 }
 0x141   : > { %v2027_v14 = vadd.f32 %v4121_v47, %v1988_v13  ;;  %v581_v46 = vrot.slane %v454_v62, 1  ;;  %v583_v59 = vrot.slane %v455_v23, 1  ;;  %v825_v49 = vrot.slane %v698_v61, 2 }
 0x142   : > { %v2028_v44 = vadd.f32 %v4121_v47, %v1989_v43  ;;  %v826_v6 = vrot.slane %v699_v5, 2  ;;  %v828_v27 = vrot.slane %v700_v26, 2  ;;  %v928_v55 = vmul.f32 %v4027_v33, %v3078_v30  ;;  %v2919_v12 = vpop.f32.mrb[0].mxu1 }
 0x143   : > { %v2059_v29 = vmax.f32 %v2027_v14, 0.0  ;;  %v582_v9 = vsel %vm504_vm0, %v580_v63, %v581_v46  ;;  %v584_v25 = vsel %vm504_vm0, %v581_v46, %v583_v59  ;;  %v929_v28 = vmul.f32 %v4031_v4, %v3078_v30  ;;  %v2294_v17 = vpop.f32.mrb[1].mxu1 }
 0x144   : > { %v2060_v18 = vmax.f32 %v2028_v44, 0.0  ;;  %v647_v58 = vadd.f32 %v582_v9, %v370_v0  ;;  %v648_v50 = vadd.f32 %v584_v25, %v371_v39  ;;  %v827_v16 = vsel %vm749_vm1, %v825_v49, %v826_v6  ;;  %v4213_v37 = vpop.f32.mrb[2].mxu1 }
 0x145   : > { %v2091_v11 = vmin.f32 %v2059_v29, 6.0  ;;  %v829_v42 = vsel %vm749_vm1, %v826_v6, %v828_v27  ;;  %v1011_v60 = vmul.f32 %v4027_v33, %v3100_v52  ;;  %v1012_v57 = vmul.f32 %v4031_v4, %v3100_v52  ;;  %v4220_v2 = vpop.f32.mrb[3].mxu1 }
 0x146   : > { %v2092_v51 = vmin.f32 %v2060_v18, 6.0  ;;  %v892_v30 = vadd.f32 %v827_v16, %v647_v58  ;;  %v893_v38 = vadd.f32 %v829_v42, %v648_v50  ;;  %v1013_v15 = vmul.f32 %v3100_v52, %v4033_v35 }
 0x147   : > { %v1255_v20 = vmul.f32 %v4027_v33, %v3103_v53  ;;  %v1137_v21 = vrot.slane %v1011_v60, 1  ;;  %v1138_v34 = vrot.slane %v1012_v57, 1  ;;  %v1256_v24 = vmul.f32 %v4031_v4, %v3103_v53 }
 0x148   : > { %v2116_v40 = vpack.c.bf16 %v2092_v51, %v2091_v11  ;;  %v960_v3 = vadd.f32 %v928_v55, %v892_v30  ;;  %v961_v19 = vadd.f32 %v929_v28, %v893_v38  ;;  %v1140_v0 = vrot.slane %v1013_v15, 1 }
 0x149   : > { %v1257_v22 = vmul.f32 %v3103_v53, %v4033_v35  ;;  %v1139_v13 = vsel %vm504_vm0, %v1137_v21, %v1138_v34  ;;  %v1381_v39 = vrot.slane %v1255_v20, 2  ;;  %v1382_v52 = vrot.slane %v1256_v24, 2 }
 0x14a   : > { %2914 = vmatmul.mubr.bf16.gmra.mrb[12].mxu0 %v2116_v40  ;;  %v1484_v33 = vmul.f32 %v3106_v54, %v4180_v7  ;;  %v1141_v45 = vsel %vm504_vm0, %v1138_v34, %v1140_v0  ;;  %v1204_v43 = vadd.f32 %v1139_v13, %v960_v3  ;;  %v1485_v4 = vmul.f32 %v3106_v54, %v4183_v8  ;;  %v4250_v54 = vld [vmem:[%s4330_s4] ss:$0 sm:$0xff] }
 0x14b   : > { %v1384_v62 = vrot.slane %v1257_v22, 2  ;;  %v1205_v23 = vadd.f32 %v1141_v45, %v961_v19  ;;  %v1383_v61 = vsel %vm749_vm1, %v1381_v39, %v1382_v52  ;;  %v1567_v53 = vmul.f32 %v3149_v36, %v4180_v7 }
 0x14c   : > { %v1568_v35 = vmul.f32 %v3149_v36, %v4183_v8  ;;  %v1448_v63 = vadd.f32 %v1383_v61, %v1204_v43  ;;  %v1569_v5 = vmul.f32 %v3149_v36, %v333_v10  ;;  %v1811_v26 = vmul.f32 %v4092_v56, %v4180_v7 }
 0x14d   : > { %v1385_v14 = vsel %vm749_vm1, %v1382_v52, %v1384_v62  ;;  %v1693_v46 = vrot.slane %v1567_v53, 1  ;;  %v1812_v49 = vmul.f32 %v4092_v56, %v4183_v8  ;;  %v1813_v36 = vmul.f32 %v4092_v56, %v333_v10 }
 0x14e   : > { %v1449_v44 = vadd.f32 %v1385_v14, %v1205_v23  ;;  %v1694_v59 = vrot.slane %v1568_v35, 1  ;;  %v1516_v29 = vadd.f32 %v1484_v33, %v1448_v63  ;;  %v1696_v6 = vrot.slane %v1569_v5, 1 }
 0x14f   : > { %v1937_v27 = vrot.slane %v1811_v26, 2  ;;  %v1938_v18 = vrot.slane %v1812_v49, 2  ;;  %v2239_v9 = vadd.f32 %v4131_v31, %v4250_v54  ;;  %v1940_v11 = vrot.slane %v1813_v36, 2 }
 0x150   : > { %v1517_v55 = vadd.f32 %v1485_v4, %v1449_v44  ;;  %v1695_v7 = vsel %vm504_vm0, %v1693_v46, %v1694_v59  ;;  %v1697_v25 = vsel %vm504_vm0, %v1694_v59, %v1696_v6  ;;  %v2303_v8 = vadd.f32 %v2919_v12, %v4250_v54 }
 0x151   : > { %v1760_v28 = vadd.f32 %v1695_v7, %v1516_v29  ;;  %v1939_v48 = vsel %vm749_vm1, %v1937_v27, %v1938_v18  ;;  %v2231_v56 = vadd.f32 %v4250_v54, %v4133_v1  ;;  %v1941_v10 = vsel %vm749_vm1, %v1938_v18, %v1940_v11 }
 0x152   : > { %v1761_v58 = vadd.f32 %v1697_v25, %v1517_v55  ;;  %v2295_v16 = vadd.f32 %v4250_v54, %v2294_v17  ;;  %v2359_v31 = vmax.f32 %v2239_v9, 0.0  ;;  %v2242_v42 = vadd.f32 %v4140_v32, %v4250_v54 }
 0x153   : > { %v2004_v50 = vadd.f32 %v1939_v48, %v1760_v28  ;;  %v2375_v57 = vmax.f32 %v2303_v8, 0.0  ;;  %v2306_v12 = vadd.f32 %v4213_v37, %v4250_v54  ;;  %v2357_v38 = vmax.f32 %v2231_v56, 0.0 }
 0x154   : > { %v2005_v51 = vadd.f32 %v1941_v10, %v1761_v58  ;;  %v2360_v1 = vmax.f32 %v2242_v42, 0.0  ;;  %v2234_v15 = vadd.f32 %v4250_v54, %v4145_v41  ;;  %v2373_v20 = vmax.f32 %v2295_v16, 0.0 }
 0x155   : > { %v2043_v60 = vadd.f32 %v4121_v47, %v2004_v50  ;;  %v2376_v40 = vmax.f32 %v2306_v12, 0.0  ;;  %v2298_v32 = vadd.f32 %v4250_v54, %v4220_v2  ;;  %v2391_v34 = vmin.f32 %v2359_v31, 6.0 }
 0x156   : > { %v2044_v30 = vadd.f32 %v4121_v47, %v2005_v51  ;;  %v2392_v24 = vmin.f32 %v2360_v1, 6.0  ;;  %v2358_v3 = vmax.f32 %v2234_v15, 0.0  ;;  %v2407_v37 = vmin.f32 %v2375_v57, 6.0 }
 0x157   : > { %v2075_v17 = vmax.f32 %v2043_v60, 0.0  ;;  %v2408_v47 = vmin.f32 %v2376_v40, 6.0  ;;  %v2374_v41 = vmax.f32 %v2298_v32, 0.0  ;;  %v2389_v22 = vmin.f32 %v2357_v38, 6.0 }
 0x158   : > { %v2076_v21 = vmax.f32 %v2044_v30, 0.0  ;;  %v2766_v2 = vpack.c.bf16 %v2392_v24, %v2391_v34  ;;  %v2390_v13 = vmin.f32 %v2358_v3, 6.0  ;;  %v2405_v39 = vmin.f32 %v2373_v20, 6.0 }
 0x159   : > { %v2107_v19 = vmin.f32 %v2075_v17, 6.0  ;;  %v2806_v52 = vpack.c.bf16 %v2408_v47, %v2407_v37  ;;  %v2406_v33 = vmin.f32 %v2374_v41, 6.0 }
 0x15a   : > { %v2108_v0 = vmin.f32 %v2076_v21, 6.0  ;;  %2846 = vst [vmem:[%s4281_s19 + $0x8] sm:$0xff] %v2766_v2   ;;  %v2761_v43 = vpack.c.bf16 %v2390_v13, %v2389_v22 }
 0x15b   : > { %2854 = vst [vmem:[%s4281_s19 + $0x48] sm:$0xff] %v2806_v52   ;;  %v2801_v62 = vpack.c.bf16 %v2406_v33, %v2405_v39 }
 0x15c   : > { %v2124_v45 = vpack.c.bf16 %v2108_v0, %v2107_v19  ;;  %2762 = vst [vmem:[%s4281_s19] sm:$0xff] %v2761_v43  }
 0x15d   : > { %2853 = vst [vmem:[%s4281_s19 + $0x40] sm:$0xff] %v2801_v62  }
 0x15e   : > { %2930 = vmatmul.mubr.bf16.gmra.mrb[12].mxu1 %v2124_v45 }
 0x17e   : > { %v2907_v4 = vpop.f32.mrb[4].mxu0 }
 0x17f   : > { %v2255_v23 = vadd.f32 %v2907_v4, %v4250_v54  ;;  %v2246_v61 = vpop.f32.mrb[5].mxu0 }
 0x180   : > { %v2247_v53 = vadd.f32 %v4250_v54, %v2246_v61  ;;  %v2908_v35 = vpop.f32.mrb[6].mxu0 }
 0x181   : > { %v2363_v14 = vmax.f32 %v2255_v23, 0.0  ;;  %v2258_v63 = vadd.f32 %v2908_v35, %v4250_v54  ;;  %v2249_v5 = vpop.f32.mrb[7].mxu0 }
 0x182   : > { %v2361_v26 = vmax.f32 %v2247_v53, 0.0  ;;  %v2250_v44 = vadd.f32 %v4250_v54, %v2249_v5 }
 0x183   : > { %v2364_v46 = vmax.f32 %v2258_v63, 0.0  ;;  %v2395_v49 = vmin.f32 %v2363_v14, 6.0 }
 0x184   : > { %v2362_v59 = vmax.f32 %v2250_v44, 0.0  ;;  %v2393_v6 = vmin.f32 %v2361_v26, 6.0 }
 0x185   : > { %v2396_v29 = vmin.f32 %v2364_v46, 6.0 }
 0x186   : > { %v2394_v36 = vmin.f32 %v2362_v59, 6.0 }
 0x187   : > { %v2776_v27 = vpack.c.bf16 %v2396_v29, %v2395_v49 }
 0x188   : > { %v2771_v55 = vpack.c.bf16 %v2394_v36, %v2393_v6 }
 0x189   : > { %2848 = vst [vmem:[%s4281_s19 + $0x18] sm:$0xff] %v2776_v27  }
 0x18a   : > { %2847 = vst [vmem:[%s4281_s19 + $0x10] sm:$0xff] %v2771_v55  }
 0x192   : > { %v2923_v7 = vpop.f32.mrb[4].mxu1 }
 0x193   : > { %v2319_v18 = vadd.f32 %v2923_v7, %v4250_v54  ;;  %v2310_v9 = vpop.f32.mrb[5].mxu1 }
 0x194   : > { %v2311_v25 = vadd.f32 %v4250_v54, %v2310_v9  ;;  %v2924_v28 = vpop.f32.mrb[6].mxu1 }
 0x195   : > { %v2379_v11 = vmax.f32 %v2319_v18, 0.0  ;;  %v2322_v8 = vadd.f32 %v2924_v28, %v4250_v54  ;;  %v2313_v58 = vpop.f32.mrb[7].mxu1 }
 0x196   : > { %v2377_v48 = vmax.f32 %v2311_v25, 0.0  ;;  %v2314_v56 = vadd.f32 %v4250_v54, %v2313_v58 }
 0x197   : > { %v2380_v10 = vmax.f32 %v2322_v8, 0.0  ;;  %v2411_v16 = vmin.f32 %v2379_v11, 6.0 }
 0x198   : > { %v2378_v50 = vmax.f32 %v2314_v56, 0.0  ;;  %v2409_v31 = vmin.f32 %v2377_v48, 6.0 }
 0x199   : > { %v2412_v51 = vmin.f32 %v2380_v10, 6.0 }
 0x19a   : > { %v2410_v42 = vmin.f32 %v2378_v50, 6.0 }
 0x19b   : > { %v2816_v60 = vpack.c.bf16 %v2412_v51, %v2411_v16 }
 0x19c   : > { %v2811_v57 = vpack.c.bf16 %v2410_v42, %v2409_v31 }
 0x19d   : > { %2856 = vst [vmem:[%s4281_s19 + $0x58] sm:$0xff] %v2816_v60  }
 0x19e   : > { %2855 = vst [vmem:[%s4281_s19 + $0x50] sm:$0xff] %v2811_v57  }
 0x1ce   : > { %v2911_v12 = vpop.f32.mrb[8].mxu0 }
 0x1cf   : > { %v2271_v30 = vadd.f32 %v2911_v12, %v4250_v54  ;;  %v2262_v38 = vpop.f32.mrb[9].mxu0 }
 0x1d0   : > { %v2263_v1 = vadd.f32 %v4250_v54, %v2262_v38  ;;  %v2912_v15 = vpop.f32.mrb[10].mxu0 }
 0x1d1   : > { %v2367_v17 = vmax.f32 %v2271_v30, 0.0  ;;  %v2274_v20 = vadd.f32 %v2912_v15, %v4250_v54  ;;  %v2265_v40 = vpop.f32.mrb[11].mxu0 }
 0x1d2   : > { %v2365_v32 = vmax.f32 %v2263_v1, 0.0  ;;  %v2266_v21 = vadd.f32 %v4250_v54, %v2265_v40 }
 0x1d3   : > { %v2368_v34 = vmax.f32 %v2274_v20, 0.0  ;;  %v2399_v3 = vmin.f32 %v2367_v17, 6.0 }
 0x1d4   : > { %v2366_v24 = vmax.f32 %v2266_v21, 0.0  ;;  %v2397_v37 = vmin.f32 %v2365_v32, 6.0 }
 0x1d5   : > { %v2400_v19 = vmin.f32 %v2368_v34, 6.0 }
 0x1d6   : > { %v2398_v47 = vmin.f32 %v2366_v24, 6.0 }
 0x1d7   : > { %v2786_v41 = vpack.c.bf16 %v2400_v19, %v2399_v3 }
 0x1d8   : > { %v2781_v0 = vpack.c.bf16 %v2398_v47, %v2397_v37 }
 0x1d9   : > { %2850 = vst [vmem:[%s4281_s19 + $0x28] sm:$0xff] %v2786_v41  }
 0x1da   : > { %2849 = vst [vmem:[%s4281_s19 + $0x20] sm:$0xff] %v2781_v0  }
 0x1e2   : > { %v2927_v22 = vpop.f32.mrb[8].mxu1 }
 0x1e3   : > { %v2335_v2 = vadd.f32 %v2927_v22, %v4250_v54  ;;  %v2326_v13 = vpop.f32.mrb[9].mxu1 }
 0x1e4   : > { %v2327_v39 = vadd.f32 %v4250_v54, %v2326_v13  ;;  %v2928_v52 = vpop.f32.mrb[10].mxu1 }
 0x1e5   : > { %v2383_v33 = vmax.f32 %v2335_v2, 0.0  ;;  %v2338_v45 = vadd.f32 %v2928_v52, %v4250_v54  ;;  %v2329_v43 = vpop.f32.mrb[11].mxu1 }
 0x1e6   : > { %v2381_v62 = vmax.f32 %v2327_v39, 0.0  ;;  %v2330_v4 = vadd.f32 %v4250_v54, %v2329_v43 }
 0x1e7   : > { %v2384_v23 = vmax.f32 %v2338_v45, 0.0  ;;  %v2415_v53 = vmin.f32 %v2383_v33, 6.0 }
 0x1e8   : > { %v2382_v61 = vmax.f32 %v2330_v4, 0.0  ;;  %v2413_v14 = vmin.f32 %v2381_v62, 6.0 }
 0x1e9   : > { %v2416_v35 = vmin.f32 %v2384_v23, 6.0 }
 0x1ea   : > { %v2414_v63 = vmin.f32 %v2382_v61, 6.0 }
 0x1eb   : > { %v2826_v5 = vpack.c.bf16 %v2416_v35, %v2415_v53 }
 0x1ec   : > { %v2821_v26 = vpack.c.bf16 %v2414_v63, %v2413_v14 }
 0x1ed   : > { %2858 = vst [vmem:[%s4281_s19 + $0x68] sm:$0xff] %v2826_v5  }
 0x1ee   : > { %2857 = vst [vmem:[%s4281_s19 + $0x60] sm:$0xff] %v2821_v26  }
 0x21d   : > { %v2915_v44 = vpop.f32.mrb[12].mxu0 }
 0x21e   : > { %v2287_v46 = vadd.f32 %v2915_v44, %v4250_v54  ;;  %v2278_v59 = vpop.f32.mrb[13].mxu0 }
 0x21f   : > { %v2279_v49 = vadd.f32 %v4250_v54, %v2278_v59  ;;  %v2916_v29 = vpop.f32.mrb[14].mxu0 }
 0x220   : > { %v2371_v6 = vmax.f32 %v2287_v46, 0.0  ;;  %v2290_v36 = vadd.f32 %v2916_v29, %v4250_v54  ;;  %v2281_v27 = vpop.f32.mrb[15].mxu0 }
 0x221   : > { %v2369_v55 = vmax.f32 %v2279_v49, 0.0  ;;  %v2282_v7 = vadd.f32 %v4250_v54, %v2281_v27 }
 0x222   : > { %v2372_v18 = vmax.f32 %v2290_v36, 0.0  ;;  %v2403_v25 = vmin.f32 %v2371_v6, 6.0 }
 0x223   : > { %v2370_v9 = vmax.f32 %v2282_v7, 0.0  ;;  %v2401_v11 = vmin.f32 %v2369_v55, 6.0 }
 0x224   : > { %v2404_v28 = vmin.f32 %v2372_v18, 6.0 }
 0x225   : > { %v2402_v8 = vmin.f32 %v2370_v9, 6.0 }
 0x226   : > { %v2796_v58 = vpack.c.bf16 %v2404_v28, %v2403_v25 }
 0x227   : > { %v2791_v48 = vpack.c.bf16 %v2402_v8, %v2401_v11 }
 0x228   : > { %2852 = vst [vmem:[%s4281_s19 + $0x38] sm:$0xff] %v2796_v58  }
 0x229   : > { %2851 = vst [vmem:[%s4281_s19 + $0x30] sm:$0xff] %v2791_v48  }
 0x231   : > { %v2931_v56 = vpop.f32.mrb[12].mxu1 }
 0x232   : > { %v2351_v10 = vadd.f32 %v2931_v56, %v4250_v54  ;;  %v2342_v50 = vpop.f32.mrb[13].mxu1 }
 0x233   : > { %v2343_v16 = vadd.f32 %v4250_v54, %v2342_v50  ;;  %v2932_v51 = vpop.f32.mrb[14].mxu1 }
 0x234   : > { %v2387_v31 = vmax.f32 %v2351_v10, 0.0  ;;  %v2354_v42 = vadd.f32 %v2932_v51, %v4250_v54  ;;  %v2345_v60 = vpop.f32.mrb[15].mxu1 }
 0x235   : > { %v2385_v57 = vmax.f32 %v2343_v16, 0.0  ;;  %v2346_v12 = vadd.f32 %v4250_v54, %v2345_v60 }
 0x236   : > { %v2388_v30 = vmax.f32 %v2354_v42, 0.0  ;;  %v2419_v1 = vmin.f32 %v2387_v31, 6.0 }
 0x237   : > { %v2386_v38 = vmax.f32 %v2346_v12, 0.0  ;;  %v2417_v17 = vmin.f32 %v2385_v57, 6.0 }
 0x238   : > { %v2420_v15 = vmin.f32 %v2388_v30, 6.0 }
 0x239   : > { %v2418_v20 = vmin.f32 %v2386_v38, 6.0 }
 0x23a   : > { %v2836_v40 = vpack.c.bf16 %v2420_v15, %v2419_v1 }
 0x23b   : > { %v2831_v32 = vpack.c.bf16 %v2418_v20, %v2417_v17 }
 0x23c   : > { %2860 = vst [vmem:[%s4281_s19 + $0x78] sm:$0xff] %v2836_v40  }
 0x23d   : > { %2859 = vst [vmem:[%s4281_s19 + $0x70] sm:$0xff] %v2831_v32  }
 0x23e PF: > { %s15_s18 = sadd.s32 1, %s2976_s18  }
 0x23f   : > { %p12_p4 = scmp.ge.s32.totalorder %s15_s18, 4  }
 0x241   :  { %14 = sbr.rel (!%p12_p4) target bundleno = 1 (0x1), region = 70 }

</bundles_post_ra>
